<compile_context>
chip_gen: v6e
topology: v6e:2x2x1
jax: 0.10.0
libtpu: 0.0.40
codegen_flags: <defaults>
</compile_context>

<pallas_src>
import functools
import math

import jax
import jax.numpy as jnp
from jax.experimental import pallas as pl
from jax.experimental.pallas import tpu as pltpu

EMBEDDING_DIM = 32
OUTPUT_SIZE1 = 240
OUTPUT_SIZE2 = 120

# Lane-padded sizes (128 multiples -> dense vector stores / full MXU passes).
PAD_K = 128    # 3*EMBEDDING_DIM = 96  -> 128
PAD_O1 = 256   # OUTPUT_SIZE1    = 240 -> 256
PAD_C = 128    # OUTPUT_SIZE2    = 120 -> 128


# ----------------------------------------------------------------------------
# Fused Pallas kernel: MLP + pyramid max-pool + fc
# ----------------------------------------------------------------------------
def fused_kernel(x_ref, w1_ref, b1_ref, w2_ref, b2_ref, wfc_ref, bfc_ref,
                 o_ref, win_ref, *, k_per_tile, win):
    """Grid = (batch, node_tiles).  Each node tile covers `k_per_tile` whole pyramid
    windows of `win` nodes each (k_per_tile * num_tiles == 8)."""
    t = pl.program_id(1)

    x = x_ref[0]                                                   # (TN, PAD_K)
    h1 = jnp.tanh(jnp.dot(x, w1_ref[...],
                          preferred_element_type=jnp.float32) + b1_ref[...])
    h2 = jnp.tanh(jnp.dot(h1, w2_ref[...],
                          preferred_element_type=jnp.float32) + b2_ref[...])  # (TN, PAD_C)

    # Per-window maxima for the k windows covered by this node tile.
    wmaxes = [jnp.max(h2[j * win:(j + 1) * win, :], axis=0, keepdims=True)
              for j in range(k_per_tile)]                          # k x (1, PAD_C)
    win_ref[pl.ds(t * k_per_tile, k_per_tile), :] = jnp.concatenate(wmaxes, axis=0)

    @pl.when(t == pl.num_programs(1) - 1)
    def _finalize():
        p4v = win_ref[...]                                         # (8, PAD_C)
        p4 = [p4v[j:j + 1, :] for j in range(8)]
        p3 = [jnp.maximum(p4[2 * j], p4[2 * j + 1]) for j in range(4)]
        p2 = [jnp.maximum(p3[2 * j], p3[2 * j + 1]) for j in range(2)]
        p1 = [jnp.maximum(p2[0], p2[1])]
        # Segment order matches the reordered fc weight rows: pool1, pool2, pool3, pool4.
        segrow = jnp.concatenate(p1 + p2 + p3 + p4, axis=1)        # (1, 15*PAD_C)
        out = jnp.dot(segrow, wfc_ref[...],
                      preferred_element_type=jnp.float32) + bfc_ref[...]
        o_ref[0] = out                                             # (1, PAD_L)


def _choose_k_per_tile(num_nodes, target_rows=512):
    """Pick windows-per-tile k in {1,2,4,8} so the node tile covers whole pyramid
    windows, is sublane-aligned (or the full node axis), and has ~target rows."""
    win = num_nodes // 8
    for k in (1, 2, 4, 8):
        tn = k * win
        if (tn % 8 == 0 or tn == num_nodes) and tn >= target_rows:
            return k
    return 8  # whole batch in one tile (small trees)


def fused_forward_pallas(x_pad, prep, *, tn, k_per_tile, win):
    B, N, Kp = x_pad.shape
    T = N // tn
    w1p, b1p = prep["w1"], prep["b1"]
    w2p, b2p = prep["w2"], prep["b2"]
    wfcp, bfcp = prep["wfc"], prep["bfc"]
    O1p, Cp, Lp = w1p.shape[1], w2p.shape[1], wfcp.shape[1]

    def const_spec(arr):
        nd = arr.ndim
        return pl.BlockSpec(arr.shape, lambda b, t, _nd=nd: (0,) * _nd)

    flops = 2 * B * N * (Kp * O1p + O1p * Cp) + 2 * B * 15 * Cp * Lp
    transcendentals = B * N * (O1p + Cp)
    bytes_accessed = 4 * (x_pad.size + w1p.size + b1p.size + w2p.size + b2p.size
                          + wfcp.size + bfcp.size + B * Lp)

    out = pl.pallas_call(
        functools.partial(fused_kernel, k_per_tile=k_per_tile, win=win),
        grid=(B, T),
        in_specs=[
            pl.BlockSpec((1, tn, Kp), lambda b, t: (b, t, 0)),     # node tiles, pipelined
            const_spec(w1p), const_spec(b1p),                      # VMEM-resident weights
            const_spec(w2p), const_spec(b2p),
            const_spec(wfcp), const_spec(bfcp),
        ],
        out_specs=pl.BlockSpec((1, 1, Lp), lambda b, t: (b, 0, 0)),
        out_shape=jax.ShapeDtypeStruct((B, 1, Lp), jnp.float32),
        scratch_shapes=[pltpu.VMEM((8, Cp), jnp.float32)],         # 8 finest-window maxima
        compiler_params=pltpu.CompilerParams(
            dimension_semantics=("parallel", "arbitrary")),
        cost_estimate=pl.CostEstimate(flops=flops,
                                      transcendentals=transcendentals,
                                      bytes_accessed=bytes_accessed),
    )(x_pad, w1p, b1p, w2p, b2p, wfcp, bfcp)
    return out[:, 0, :]                                            # (B, PAD_L)


# ----------------------------------------------------------------------------
# Plain-JAX glue: tree-convolution feature construction (gather + tiny contraction)
# ----------------------------------------------------------------------------
def tree_conv_features(nodes, children):
    B, N, E = nodes.shape
    MC = children.shape[2]

    zero = jnp.zeros((B, 1, E), jnp.float32)
    vector_lookup = jnp.concatenate([zero, nodes[:, 1:, :]], axis=1)  # (B, N, E)
    # NOTE: the reference PyTorch code indexes vector_lookup[0] for EVERY batch
    # (all batches gather from batch 0's lookup table) — reproduced exactly.
    children_tensor = vector_lookup[0][children]                      # (B, N, MC, E)
    tree = jnp.concatenate([nodes[:, :, None, :], children_tensor], axis=2)

    c_t = jnp.concatenate(
        [jnp.ones((B, N, 1), jnp.float32), jnp.zeros((B, N, MC), jnp.float32)], axis=2)
    ch_f = children.astype(jnp.float32)
    num_siblings = jnp.sum((ch_f != 0.0).astype(jnp.float32), axis=2, keepdims=True)
    num_siblings = jnp.broadcast_to(num_siblings, (B, N, MC + 1))
    mask = jnp.concatenate(
        [jnp.zeros((B, N, 1), jnp.float32), jnp.minimum(ch_f, 1.0)], axis=2)
    child_indices = jnp.arange(-1, MC, dtype=jnp.float32)[None, None, :] * mask
    singles = jnp.concatenate(
        [jnp.zeros((B, N, 1), jnp.float32),
         jnp.full((B, N, 1), 0.5, jnp.float32),
         jnp.zeros((B, N, MC - 1), jnp.float32)], axis=2)
    c_r = jnp.where(
        num_siblings == 1.0,
        singles,
        (1.0 - c_t) * (child_indices / (num_siblings - 1.0)),
    )
    c_l = (1.0 - c_t) * (1.0 - c_r) * mask
    coef = jnp.stack([c_t, c_r, c_l], axis=3)                         # (B, N, MC+1, 3)

    res = jnp.einsum("bnye,bnyc->bnec", tree, coef)
    return res.reshape(B, N, 3 * E)


def reorder_fc_weight(wfc):
    """Reorder fc weight (L, 15*C) -> (15, C, L) to match PyTorch pooling flatten order."""
    L = wfc.shape[0]
    C = OUTPUT_SIZE2
    wt = wfc.T                                                  # (15*C, L)
    w1 = wt[0:C][None]                                          # (1, C, L)
    w2 = wt[C:3 * C].reshape(C, 2, L).transpose(1, 0, 2)        # (2, C, L)
    w3 = wt[3 * C:7 * C].reshape(C, 4, L).transpose(1, 0, 2)    # (4, C, L)
    w4 = wt[7 * C:15 * C].reshape(C, 8, L).transpose(1, 0, 2)   # (8, C, L)
    return jnp.concatenate([w1, w2, w3, w4], axis=0)            # (15, C, L)


# ----------------------------------------------------------------------------
# Parameters
# ----------------------------------------------------------------------------
def init_params(key, label_size):
    def linear(k, fan_out, fan_in):
        kw, kb = jax.random.split(k)
        bound = 1.0 / math.sqrt(fan_in)
        w = jax.random.uniform(kw, (fan_out, fan_in), jnp.float32, -bound, bound)
        b = jax.random.uniform(kb, (fan_out,), jnp.float32, -bound, bound)
        return w, b

    k1, k2, k3 = jax.random.split(key, 3)
    w1, b1 = linear(k1, OUTPUT_SIZE1, 3 * EMBEDDING_DIM)
    w2, b2 = linear(k2, OUTPUT_SIZE2, OUTPUT_SIZE1)
    wfc, bfc = linear(k3, label_size, 15 * OUTPUT_SIZE2)
    return dict(w1=w1, b1=b1, w2=w2, b2=b2, wfc=wfc, bfc=bfc)


def prepare_params(params):
    """One-time transpose / reorder / zero-pad of weights into kernel layout (hoisted
    out of the per-forward path).  Padded rows/cols are zero so results are unchanged."""
    K, O1, C = 3 * EMBEDDING_DIM, OUTPUT_SIZE1, OUTPUT_SIZE2
    L = params["wfc"].shape[0]
    Lp = ((L + 127) // 128) * 128

    w1p = jnp.zeros((PAD_K, PAD_O1), jnp.float32).at[:K, :O1].set(params["w1"].T)
    b1p = jnp.zeros((1, PAD_O1), jnp.float32).at[:, :O1].set(params["b1"][None, :])
    w2p = jnp.zeros((PAD_O1, PAD_C), jnp.float32).at[:O1, :C].set(params["w2"].T)
    b2p = jnp.zeros((1, PAD_C), jnp.float32).at[:, :C].set(params["b2"][None, :])

    w_re = reorder_fc_weight(params["wfc"])                       # (15, C, L)
    wfcp = (jnp.zeros((15, PAD_C, Lp), jnp.float32)
            .at[:, :C, :L].set(w_re)
            .reshape(15 * PAD_C, Lp))                             # (15*PAD_C, Lp)
    bfcp = jnp.zeros((1, Lp), jnp.float32).at[:, :L].set(params["bfc"][None, :])
    return dict(w1=w1p, b1=b1p, w2=w2p, b2=b2p, wfc=wfcp, bfc=bfcp)


# ----------------------------------------------------------------------------
# Forward
# ----------------------------------------------------------------------------
@functools.partial(jax.jit, static_argnames=("label_size",))
def tbspp_forward(nodes, children, prep, *, label_size):
    B, N, E = nodes.shape
    assert N % 8 == 0, "pyramid pooling requires num_nodes divisible by 8"

    feat = tree_conv_features(nodes, children)                    # (B, N, 3E)
    x = jnp.pad(feat, ((0, 0), (0, 0), (0, PAD_K - feat.shape[-1])))  # (B, N, PAD_K)

    win = N // 8
    k = _choose_k_per_tile(N)
    tn = k * win
    out_pad = fused_forward_pallas(x, prep, tn=tn, k_per_tile=k, win=win)
    return out_pad[:, :label_size]


# Pure-JAX reference (mirrors the PyTorch module) for a correctness self-check.
def tbspp_reference(nodes, children, params):
    B, N, _ = nodes.shape
    C = OUTPUT_SIZE2
    feat = tree_conv_features(nodes, children)
    h1 = jnp.tanh(feat @ params["w1"].T + params["b1"])
    h2 = jnp.tanh(h1 @ params["w2"].T + params["b2"])             # (B, N, C)
    pools = []
    for nwin in (1, 2, 4, 8):
        p = h2.reshape(B, nwin, N // nwin, C).max(axis=2)         # (B, nwin, C)
        pools.append(p.transpose(0, 2, 1).reshape(B, nwin * C))   # channel-major flatten
    pooled = jnp.concatenate(pools, axis=1)                       # (B, 15*C)
    return pooled @ params["wfc"].T + params["bfc"]


if __name__ == "__main__":
    key = jax.random.PRNGKey(0)
    B, N, MC, LABELS = 2, 16, 4, 10

    k_nodes, k_child, k_params = jax.random.split(key, 3)
    nodes = jax.random.normal(k_nodes, (B, N, EMBEDDING_DIM), jnp.float32)
    children = jax.random.randint(k_child, (B, N, MC), 0, N, dtype=jnp.int32)
    params = init_params(k_params, LABELS)
    prep = prepare_params(params)   # one-time weight transpose/pad/reorder (hoisted)

    out = tbspp_forward(nodes, children, prep, label_size=LABELS)
    out = jax.block_until_ready(out)
    assert out.shape == (B, LABELS) and out.dtype == jnp.float32

    ref = jax.block_until_ready(tbspp_reference(nodes, children, params))
    assert bool(jnp.allclose(out, ref, atol=1e-3, rtol=1e-3)), "mismatch vs reference"

    print("KERNEL_OK")
</pallas_src>

<mosaic_0001>
module attributes {stable_mosaic.version = 11 : i64} {
  func.func @fused_kernel(%arg0: i32, %arg1: i32, %arg2: memref<1x16x128xf32, #tpu.memory_space<vmem>>, %arg3: memref<128x256xf32, #tpu.memory_space<vmem>>, %arg4: memref<1x256xf32, #tpu.memory_space<vmem>>, %arg5: memref<256x128xf32, #tpu.memory_space<vmem>>, %arg6: memref<1x128xf32, #tpu.memory_space<vmem>>, %arg7: memref<1920x128xf32, #tpu.memory_space<vmem>>, %arg8: memref<1x128xf32, #tpu.memory_space<vmem>>, %arg9: memref<1x1x128xf32, #tpu.memory_space<vmem>>, %arg10: memref<8x128xf32, #tpu.memory_space<vmem>>) attributes {dimension_semantics = [#tpu.dimension_semantics<parallel>, #tpu.dimension_semantics<arbitrary>], iteration_bounds = array<i64: 2, 1>, scalar_prefetch = 0 : i64, scratch_operands = 1 : i64, tpu.core_type = #tpu.core_type<tc>, window_params = [{transform_indices = @transform_0, window_bounds = array<i64: 1, 16, 128>}, {pipeline_mode = #tpu.pipeline_mode<synchronous>, transform_indices = @transform_1, window_bounds = array<i64: 128, 256>}, {pipeline_mode = #tpu.pipeline_mode<synchronous>, transform_indices = @transform_2, window_bounds = array<i64: 1, 256>}, {pipeline_mode = #tpu.pipeline_mode<synchronous>, transform_indices = @transform_3, window_bounds = array<i64: 256, 128>}, {pipeline_mode = #tpu.pipeline_mode<synchronous>, transform_indices = @transform_4, window_bounds = array<i64: 1, 128>}, {pipeline_mode = #tpu.pipeline_mode<synchronous>, transform_indices = @transform_5, window_bounds = array<i64: 1920, 128>}, {pipeline_mode = #tpu.pipeline_mode<synchronous>, transform_indices = @transform_6, window_bounds = array<i64: 1, 128>}, {transform_indices = @transform_7, window_bounds = array<i64: 1, 1, 128>}]} {
    %c0 = arith.constant 0 : index
    %c0_0 = arith.constant 0 : index
    %c0_1 = arith.constant 0 : index
    %0 = vector.load %arg2[%c0, %c0_0, %c0_1] : memref<1x16x128xf32, #tpu.memory_space<vmem>>, vector<1x16x128xf32>
    %1 = vector.shape_cast %0 : vector<1x16x128xf32> to vector<16x128xf32>
    %c0_2 = arith.constant 0 : index
    %c0_3 = arith.constant 0 : index
    %2 = vector.load %arg3[%c0_2, %c0_3] : memref<128x256xf32, #tpu.memory_space<vmem>>, vector<128x256xf32>
    %cst = arith.constant dense<0.000000e+00> : vector<16x256xf32>
    %3 = tpu.matmul %1, %2, %cst {dimension_numbers = #tpu.dot_dimension_numbers<[1], [0], [0], [1], [0, 0, 1, 1], [], []>} : vector<16x128xf32>, vector<128x256xf32>, vector<16x256xf32> -> vector<16x256xf32>
    %c0_4 = arith.constant 0 : index
    %c0_5 = arith.constant 0 : index
    %4 = vector.load %arg4[%c0_4, %c0_5] : memref<1x256xf32, #tpu.memory_space<vmem>>, vector<1x256xf32>
    %5 = vector.broadcast %4 : vector<1x256xf32> to vector<16x256xf32>
    %6 = arith.addf %3, %5 : vector<16x256xf32>
    %7 = math.tanh %6 : vector<16x256xf32>
    %c0_6 = arith.constant 0 : index
    %c0_7 = arith.constant 0 : index
    %8 = vector.load %arg5[%c0_6, %c0_7] : memref<256x128xf32, #tpu.memory_space<vmem>>, vector<256x128xf32>
    %cst_8 = arith.constant dense<0.000000e+00> : vector<16x128xf32>
    %9 = tpu.matmul %7, %8, %cst_8 {dimension_numbers = #tpu.dot_dimension_numbers<[1], [0], [0], [1], [0, 0, 1, 1], [], []>} : vector<16x256xf32>, vector<256x128xf32>, vector<16x128xf32> -> vector<16x128xf32>
    %c0_9 = arith.constant 0 : index
    %c0_10 = arith.constant 0 : index
    %10 = vector.load %arg6[%c0_9, %c0_10] : memref<1x128xf32, #tpu.memory_space<vmem>>, vector<1x128xf32>
    %11 = vector.broadcast %10 : vector<1x128xf32> to vector<16x128xf32>
    %12 = arith.addf %9, %11 : vector<16x128xf32>
    %13 = math.tanh %12 : vector<16x128xf32>
    %14 = vector.extract_strided_slice %13 {offsets = [0, 0], sizes = [2, 128], strides = [1, 1]} : vector<16x128xf32> to vector<2x128xf32>
    %cst_11 = arith.constant dense<0xFF800000> : vector<128xf32>
    %15 = vector.multi_reduction <maximumf>, %14, %cst_11 [0] : vector<2x128xf32> to vector<128xf32>
    %16 = vector.shape_cast %15 : vector<128xf32> to vector<1x128xf32>
    %17 = vector.extract_strided_slice %13 {offsets = [2, 0], sizes = [2, 128], strides = [1, 1]} : vector<16x128xf32> to vector<2x128xf32>
    %cst_12 = arith.constant dense<0xFF800000> : vector<128xf32>
    %18 = vector.multi_reduction <maximumf>, %17, %cst_12 [0] : vector<2x128xf32> to vector<128xf32>
    %19 = vector.shape_cast %18 : vector<128xf32> to vector<1x128xf32>
    %20 = vector.extract_strided_slice %13 {offsets = [4, 0], sizes = [2, 128], strides = [1, 1]} : vector<16x128xf32> to vector<2x128xf32>
    %cst_13 = arith.constant dense<0xFF800000> : vector<128xf32>
    %21 = vector.multi_reduction <maximumf>, %20, %cst_13 [0] : vector<2x128xf32> to vector<128xf32>
    %22 = vector.shape_cast %21 : vector<128xf32> to vector<1x128xf32>
    %23 = vector.extract_strided_slice %13 {offsets = [6, 0], sizes = [2, 128], strides = [1, 1]} : vector<16x128xf32> to vector<2x128xf32>
    %cst_14 = arith.constant dense<0xFF800000> : vector<128xf32>
    %24 = vector.multi_reduction <maximumf>, %23, %cst_14 [0] : vector<2x128xf32> to vector<128xf32>
    %25 = vector.shape_cast %24 : vector<128xf32> to vector<1x128xf32>
    %26 = vector.extract_strided_slice %13 {offsets = [8, 0], sizes = [2, 128], strides = [1, 1]} : vector<16x128xf32> to vector<2x128xf32>
    %cst_15 = arith.constant dense<0xFF800000> : vector<128xf32>
    %27 = vector.multi_reduction <maximumf>, %26, %cst_15 [0] : vector<2x128xf32> to vector<128xf32>
    %28 = vector.shape_cast %27 : vector<128xf32> to vector<1x128xf32>
    %29 = vector.extract_strided_slice %13 {offsets = [10, 0], sizes = [2, 128], strides = [1, 1]} : vector<16x128xf32> to vector<2x128xf32>
    %cst_16 = arith.constant dense<0xFF800000> : vector<128xf32>
    %30 = vector.multi_reduction <maximumf>, %29, %cst_16 [0] : vector<2x128xf32> to vector<128xf32>
    %31 = vector.shape_cast %30 : vector<128xf32> to vector<1x128xf32>
    %32 = vector.extract_strided_slice %13 {offsets = [12, 0], sizes = [2, 128], strides = [1, 1]} : vector<16x128xf32> to vector<2x128xf32>
    %cst_17 = arith.constant dense<0xFF800000> : vector<128xf32>
    %33 = vector.multi_reduction <maximumf>, %32, %cst_17 [0] : vector<2x128xf32> to vector<128xf32>
    %34 = vector.shape_cast %33 : vector<128xf32> to vector<1x128xf32>
    %35 = vector.extract_strided_slice %13 {offsets = [14, 0], sizes = [2, 128], strides = [1, 1]} : vector<16x128xf32> to vector<2x128xf32>
    %cst_18 = arith.constant dense<0xFF800000> : vector<128xf32>
    %36 = vector.multi_reduction <maximumf>, %35, %cst_18 [0] : vector<2x128xf32> to vector<128xf32>
    %37 = vector.shape_cast %36 : vector<128xf32> to vector<1x128xf32>
    %38 = tpu.concatenate %16, %19, %22, %25, %28, %31, %34, %37 in 0 : vector<1x128xf32>, vector<1x128xf32>, vector<1x128xf32>, vector<1x128xf32>, vector<1x128xf32>, vector<1x128xf32>, vector<1x128xf32>, vector<1x128xf32> -> vector<8x128xf32>
    %c8_i32 = arith.constant 8 : i32
    %39 = arith.muli %arg1, %c8_i32 : i32
    %40 = arith.index_cast %39 : i32 to index
    %c0_19 = arith.constant 0 : index
    %41 = vector.load %arg10[%40, %c0_19] : memref<8x128xf32, #tpu.memory_space<vmem>>, vector<8x128xf32>
    tpu.vector_store %arg10[%40, %c0_19], %38 {strides = array<i32>} : memref<8x128xf32, #tpu.memory_space<vmem>>, vector<8x128xf32>,
    %c0_i32 = arith.constant 0 : i32
    %42 = arith.cmpi eq, %arg1, %c0_i32 : i32
    %43 = arith.extui %42 : i1 to i32
    %c0_i32_20 = arith.constant 0 : i32
    %44 = arith.cmpi ne, %43, %c0_i32_20 : i32
    scf.if %44 {
      %c0_21 = arith.constant 0 : index
      %c0_22 = arith.constant 0 : index
      %45 = vector.load %arg10[%c0_21, %c0_22] : memref<8x128xf32, #tpu.memory_space<vmem>>, vector<8x128xf32>
      %46 = vector.extract_strided_slice %45 {offsets = [0, 0], sizes = [1, 128], strides = [1, 1]} : vector<8x128xf32> to vector<1x128xf32>
      %47 = vector.extract_strided_slice %45 {offsets = [1, 0], sizes = [1, 128], strides = [1, 1]} : vector<8x128xf32> to vector<1x128xf32>
      %48 = vector.extract_strided_slice %45 {offsets = [2, 0], sizes = [1, 128], strides = [1, 1]} : vector<8x128xf32> to vector<1x128xf32>
      %49 = vector.extract_strided_slice %45 {offsets = [3, 0], sizes = [1, 128], strides = [1, 1]} : vector<8x128xf32> to vector<1x128xf32>
      %50 = vector.extract_strided_slice %45 {offsets = [4, 0], sizes = [1, 128], strides = [1, 1]} : vector<8x128xf32> to vector<1x128xf32>
      %51 = vector.extract_strided_slice %45 {offsets = [5, 0], sizes = [1, 128], strides = [1, 1]} : vector<8x128xf32> to vector<1x128xf32>
      %52 = vector.extract_strided_slice %45 {offsets = [6, 0], sizes = [1, 128], strides = [1, 1]} : vector<8x128xf32> to vector<1x128xf32>
      %53 = vector.extract_strided_slice %45 {offsets = [7, 0], sizes = [1, 128], strides = [1, 1]} : vector<8x128xf32> to vector<1x128xf32>
      %54 = arith.maximumf %46, %47 : vector<1x128xf32>
      %55 = arith.maximumf %48, %49 : vector<1x128xf32>
      %56 = arith.maximumf %50, %51 : vector<1x128xf32>
      %57 = arith.maximumf %52, %53 : vector<1x128xf32>
      %58 = arith.maximumf %54, %55 : vector<1x128xf32>
      %59 = arith.maximumf %56, %57 : vector<1x128xf32>
      %60 = arith.maximumf %58, %59 : vector<1x128xf32>
      %61 = tpu.concatenate %60, %58, %59, %54, %55, %56, %57, %46, %47, %48, %49, %50, %51, %52, %53 in 1 : vector<1x128xf32>, vector<1x128xf32>, vector<1x128xf32>, vector<1x128xf32>, vector<1x128xf32>, vector<1x128xf32>, vector<1x128xf32>, vector<1x128xf32>, vector<1x128xf32>, vector<1x128xf32>, vector<1x128xf32>, vector<1x128xf32>, vector<1x128xf32>, vector<1x128xf32>, vector<1x128xf32> -> vector<1x1920xf32>
      %c0_23 = arith.constant 0 : index
      %c0_24 = arith.constant 0 : index
      %62 = vector.load %arg7[%c0_23, %c0_24] : memref<1920x128xf32, #tpu.memory_space<vmem>>, vector<1920x128xf32>
      %cst_25 = arith.constant dense<0.000000e+00> : vector<1x128xf32>
      %63 = tpu.matmul %61, %62, %cst_25 {dimension_numbers = #tpu.dot_dimension_numbers<[1], [0], [0], [1], [0, 0, 1, 1], [], []>} : vector<1x1920xf32>, vector<1920x128xf32>, vector<1x128xf32> -> vector<1x128xf32>
      %c0_26 = arith.constant 0 : index
      %c0_27 = arith.constant 0 : index
      %64 = vector.load %arg8[%c0_26, %c0_27] : memref<1x128xf32, #tpu.memory_space<vmem>>, vector<1x128xf32>
      %65 = arith.addf %63, %64 : vector<1x128xf32>
      %c0_28 = arith.constant 0 : index
      %c0_29 = arith.constant 0 : index
      %c0_30 = arith.constant 0 : index
      %66 = vector.load %arg9[%c0_28, %c0_29, %c0_30] : memref<1x1x128xf32, #tpu.memory_space<vmem>>, vector<1x1x128xf32>
      %67 = vector.shape_cast %66 : vector<1x1x128xf32> to vector<1x128xf32>
      %68 = vector.shape_cast %65 : vector<1x128xf32> to vector<1x1x128xf32>
      tpu.vector_store %arg9[%c0_28, %c0_29, %c0_30], %68 {strides = array<i32>} : memref<1x1x128xf32, #tpu.memory_space<vmem>>, vector<1x1x128xf32>,
    } else {
    }
    return
  }
  func.func @transform_0(%arg0: i32, %arg1: i32) -> (i32, i32, i32) {
    %c0_i32 = arith.constant 0 : i32
    %c0_i32_0 = arith.constant 0 : i32
    return %arg0, %arg1, %c0_i32 : i32, i32, i32
  }
  func.func @transform_1(%arg0: i32, %arg1: i32) -> (i32, i32) {
    %c0_i32 = arith.constant 0 : i32
    %c0_i32_0 = arith.constant 0 : i32
    %c0_i32_1 = arith.constant 0 : i32
    return %c0_i32, %c0_i32_0 : i32, i32
  }
  func.func @transform_2(%arg0: i32, %arg1: i32) -> (i32, i32) {
    %c0_i32 = arith.constant 0 : i32
    %c0_i32_0 = arith.constant 0 : i32
    %c0_i32_1 = arith.constant 0 : i32
    return %c0_i32, %c0_i32_0 : i32, i32
  }
  func.func @transform_3(%arg0: i32, %arg1: i32) -> (i32, i32) {
    %c0_i32 = arith.constant 0 : i32
    %c0_i32_0 = arith.constant 0 : i32
    %c0_i32_1 = arith.constant 0 : i32
    return %c0_i32, %c0_i32_0 : i32, i32
  }
  func.func @transform_4(%arg0: i32, %arg1: i32) -> (i32, i32) {
    %c0_i32 = arith.constant 0 : i32
    %c0_i32_0 = arith.constant 0 : i32
    %c0_i32_1 = arith.constant 0 : i32
    return %c0_i32, %c0_i32_0 : i32, i32
  }
  func.func @transform_5(%arg0: i32, %arg1: i32) -> (i32, i32) {
    %c0_i32 = arith.constant 0 : i32
    %c0_i32_0 = arith.constant 0 : i32
    %c0_i32_1 = arith.constant 0 : i32
    return %c0_i32, %c0_i32_0 : i32, i32
  }
  func.func @transform_6(%arg0: i32, %arg1: i32) -> (i32, i32) {
    %c0_i32 = arith.constant 0 : i32
    %c0_i32_0 = arith.constant 0 : i32
    %c0_i32_1 = arith.constant 0 : i32
    return %c0_i32, %c0_i32_0 : i32, i32
  }
  func.func @transform_7(%arg0: i32, %arg1: i32) -> (i32, i32, i32) {
    %c0_i32 = arith.constant 0 : i32
    %c0_i32_0 = arith.constant 0 : i32
    %c0_i32_1 = arith.constant 0 : i32
    return %arg0, %c0_i32, %c0_i32_0 : i32, i32, i32
  }
}

</mosaic_0001>

<bundles_post_ra>
// kernel: tbspp_forward.1
= control target key start
LH: loop header
LB: loop body
LE: loop exit
PB: predicated region body
PF: predicated region fallthrough
CT: control target
= control target key end

     0   :  { %12 = vsyncpa [#allocation4], 0  ;;  %s2531_s0 = inlined_call_operand.vmem [shape: f32[2,16,128], index: 0, kind: input, shape index: {}]   ;;  %s2532_s1 = inlined_call_operand.vmem [shape: f32[128,256], index: 1, kind: input, shape index: {}]   ;;  %s2533_s2 = inlined_call_operand.vmem [shape: f32[1,256], index: 2, kind: input, shape index: {}]   ;;  %s2534_s3 = inlined_call_operand.vmem [shape: f32[256,128], index: 3, kind: input, shape index: {}]   ;;  %s2535_s4 = inlined_call_operand.vmem [shape: f32[1,128], index: 4, kind: input, shape index: {}]   ;;  %s2536_s5 = inlined_call_operand.hbm [shape: f32[1920,128], index: 5, kind: input, shape index: {}]   ;;  %s2537_s6 = inlined_call_operand.vmem [shape: f32[1,128], index: 6, kind: input, shape index: {}]   ;;  %s2538_s7 = inlined_call_operand.hbm [shape: f32[2,1,128], index: 7, kind: output, shape index: {}]  }
   0x1   :  { %13 = vsyncpa [#allocation5], 0 }
   0x2   :  { %15 = vsyncpa [#allocation5 + $0x1], 0  ;;  %s2154_s24 = smov 0   ;;  %s2156_s25 = smov 0  }
   0x3   :  { %s2158_s26 = smov 0   ;;  %s2160_s27 = smov 0  }
   0x4   :  { %s2162_s28 = smov 0   ;;  %s2164_s29 = smov 0  }
   0x5 LB: > { %s1569_s30 = sadd.s32 4294967295, %s2106_s29   ;;  %s1570_s8 = sadd.s32 4294967294, %s2106_s29   ;;  %s2106_s29 = sphi %s2164_s29, %s21_s29   ;;  %s2102_s28 = sphi %s2162_s28, %s2547_s28   ;;  %s2098_s27 = sphi %s2160_s27, %s2546_s27   ;;  %s2094_s26 = sphi %s2158_s26, %s2545_s26   ;;  %s2090_s25 = sphi %s2156_s25, %s2544_s25   ;;  %s2086_s24 = sphi %s2154_s24, %s2543_s24  }
   0x6   : > { %s33_s9 = sadd.s32 1, %s2102_s28  ;;  %s194_s10 = sadd.s32 1, %s2094_s26 }
   0x7   : > { %p35_p0 = scmp.ge.s32.totalorder %s33_s9, 2  ;;  %p204_p1 = scmp.ne.s32.totalorder %s2094_s26, %s2090_s25 }
   0x8   : > { %p205_p2 = scmp.eq.s32.totalorder %s1569_s30, 1  ;;  %p210_p3 = scmp.ne.s32.totalorder %s2090_s25, %s2086_s24 }
   0x9   : > { %s2549_s9 = smov (%p35_p0, %s33_s9), 0  ;;  %p211_p5 = scmp.eq.s32.totalorder %s1570_s8, 1 }
   0xa   : > { %p2194_p4 = por %p205_p2, %p204_p1  ;;  %s191_s12 = ssub.s32 %s2102_s28, %s2549_s9 }
   0xb   : > { %p1571_p6 = scmp.ge.s32.totalorder %s2106_s29, 1  ;;  %p192_p7 = scmp.eq.s32.totalorder %s191_s12, 0 }
   0xc   : > { %p2201_p8 = por %p211_p5, %p210_p3  ;;  %p218_p9 = scmp.lt.s32.totalorder %s2106_s29, 3 }
   0xd   : > { %s2207_s14 = scalar_select %p192_p7, %s2094_s26, %s194_s10  }
   0xe   : > { %p2209_p10 = pnand %p1571_p6, %p218_p9  ;;  %p2213_p11 = scmp.eq.s32.totalorder %s1569_s30, 0 }
   0xf   : > { %s2108_s17 = smov [#allocation3]  }
  0x10   : > { %p1924_p12 = pneg %p2209_p10  ;;  %s242_s18 = sshll.u32 %s2108_s17, 4  ;;  %s243_s18 = int_to_ptr.vmem [resolvable:$true] %s242_s18 }
  0x11   : > { %s2011_s19 = scalar_lea.vmem %s243_s18, 30720  ;;  %p2019_p5 = scmp.lt.s32.totalorder %s243_s18, %s243_s18 }
  0x12   : > { %p1925_p13 = pnand %p2213_p11, %p1924_p12  ;;  %p2012_p1 = scmp.ne.s32.totalorder %s243_s18, %s2011_s19 }
  0x13   : > { %p2020_p6 = scmp.lt.s32.totalorder %s2011_s19, %s2011_s19 }
  0x14   : > { %p2002_p0 = pneg %p1925_p13 }
  0x15   : > { %p2021_p7 = por %p2020_p6, %p2019_p5 }
  0x16   : > { %p2014_p2 = pnand %p2012_p1, %p2002_p0 }
  0x18   : > { %p2015_p3 = pneg %p2014_p2 }
  0x1a   : > { %p2022_p9 = pnand %p2021_p7, %p2015_p3 }
  0x1c   : > { %2025 = shalt.err (!%p2022_p9)
}
  0x1d   : > { %s2109_s20 = smov 128   ;;  %s2110_s21 = smov 8  }
  0x1e   : > { %1927 = dma.hbm_to_vmem [thread:$0]  (!%p1925_p13), %s2536_s5, 30720, %s243_s18, [#allocation4], %s2109_s20, %s2109_s20, %s2110_s21  }
  0x1f   : > { %274 = sbr.rel (%p2209_p10) target bundleno = 843 (0x34b), region = 48 }
  0x24   : > { %2077 = dma.done.wait (%p2213_p11), [#allocation4], 30720  }
  0x25   : > { %2079 = vsyncadd (%p2213_p11), [#allocation4], 4294936576  ;;  %v2111_v0 = vmov 0.0   ;;  %v352_v1 = vld [vmem:[%s2532_s1 + $0xf8] sm:$0xff]  ;;  %v351_v2 = vld [vmem:[%s2532_s1 + $0xf0] sm:$0xff]  ;;  %p310_p10 = scmp.lt.s32.totalorder %s2098_s27, 1 }
  0x26   : > { %429 = vmatprep.mubr.f32.mxu0 %v2111_v0  ;;  %v350_v3 = vld [vmem:[%s2532_s1 + $0xe8] sm:$0xff]  ;;  %365 = vmatprep.subr.mxu0 %v352_v1  ;;  %v349_v4 = vld [vmem:[%s2532_s1 + $0xe0] sm:$0xff]  ;;  %v348_v5 = vld [vmem:[%s2532_s1 + $0xd8] sm:$0xff]  ;;  %vm562_vm0 = vcmask 1041408   ;;  %vm570_vm1 = vcmask 1043458   ;;  %vm578_vm2 = vcmask 1045508  }
  0x27   : > { %366 = vmatpush1.msra.mxu0 %v351_v2  ;;  %v347_v6 = vld [vmem:[%s2532_s1 + $0xd0] sm:$0xff]  ;;  %v346_v7 = vld [vmem:[%s2532_s1 + $0xc8] sm:$0xff]  ;;  %v345_v8 = vld [vmem:[%s2532_s1 + $0xc0] sm:$0xff]  ;;  %s311_s12 = scalar_select %p310_p10, %s2098_s27, 1  ;;  %vm586_vm3 = vcmask 1047558   ;;  %vm622_vm4 = vcmask 1040384  }
  0x28   : > { %367 = vmatprep.subr.mxu0 %v350_v3  ;;  %v344_v9 = vld [vmem:[%s2532_s1 + $0xb8] sm:$0xff]  ;;  %v343_v10 = vld [vmem:[%s2532_s1 + $0xb0] sm:$0xff]  ;;  %v342_v11 = vld [vmem:[%s2532_s1 + $0xa8] sm:$0xff]  ;;  %vm625_vm5 = vcmask 1042432   ;;  %vm627_vm6 = vcmask 1043456   ;;  %vm629_vm7 = vcmask 1044480  }
  0x29   : > { %368 = vmatpush1.msra.mxu0 %v349_v4  ;;  %v341_v12 = vld [vmem:[%s2532_s1 + $0xa0] sm:$0xff]  ;;  %v340_v13 = vld [vmem:[%s2532_s1 + $0x98] sm:$0xff]  ;;  %v339_v14 = vld [vmem:[%s2532_s1 + $0x90] sm:$0xff]  ;;  %s1582_s8 = sshll.u32 %s311_s12, 4  ;;  %v355_v4 = vlaneseq  ;;  %vm631_vm8 = vcmask 1045504   ;;  %vm633_vm9 = vcmask 1046528  }
  0x2a   : > { %369 = vmatprep.subr.mxu0 %v348_v5  ;;  %v477_v15 = vld [vmem:[%s2534_s3 + $0xf8] sm:$0xff]  ;;  %v338_v17 = vld [vmem:[%s2532_s1 + $0x88] sm:$0xff]  ;;  %v476_v18 = vld [vmem:[%s2534_s3 + $0xf0] sm:$0xff]  ;;  %s317_s22 = scalar_lea.vmem %s2531_s0, %s1582_s8  ;;  %vm2112_vm10 = vmmov 0   ;;  %s307_s21 = sand.u32 1, %s2090_s25  }
  0x2b   : > { %370 = vmatpush1.msra.mxu0 %v347_v6  ;;  %v461_v16 = vld [vmem:[%s2534_s3 + $0x78] sm:$0xff]  ;;  %1583 = vmatprep.subr.mxu1 %v477_v15  ;;  %v460_v19 = vld [vmem:[%s2534_s3 + $0x70] sm:$0xff]  ;;  %v337_v20 = vld [vmem:[%s2532_s1 + $0x80] sm:$0xff]  ;;  %v356_v5 = vshrl.u32 %v355_v4, 7  ;;  %s308_s12 = scalar_lea.vmem [#allocation6], %s307_s21  ;;  %s1474_s17 = scalar_lea.sflag [#allocation5], %s307_s21 }
  0x2c   : > { %371 = vmatprep.subr.mxu0 %v346_v7  ;;  %1584 = vmatpush3.msra.mxu1 %v461_v16  ;;  %v475_v21 = vld [vmem:[%s2534_s3 + $0xe8] sm:$0xff]  ;;  %v336_v22 = vld [vmem:[%s2532_s1 + $0x78] sm:$0xff]  ;;  %v335_v24 = vld [vmem:[%s2532_s1 + $0x70] sm:$0xff]  ;;  %s1486_s23 = sshll.u32 %s308_s12, 4  ;;  %s2113_s18 = smov [#allocation6]   ;;  %s1487_s23 = int_to_ptr.vmem [resolvable:$true] %s1486_s23 }
  0x2d   : > { %372 = vmatpush1.msra.mxu0 %v345_v8  ;;  %1585 = vmatprep.subr.mxu1 %v476_v18  ;;  %v459_v23 = vld [vmem:[%s2534_s3 + $0x68] sm:$0xff]  ;;  %v474_v25 = vld [vmem:[%s2534_s3 + $0xe0] sm:$0xff]  ;;  %v473_v29 = vld [vmem:[%s2534_s3 + $0xd8] sm:$0xff]  ;;  %v357_v6 = vsub.s32 0, %v356_v5  ;;  %v361_v8 = vsub.s32 1, %v356_v5  ;;  %s2026_s15 = scalar_lea.vmem %s1487_s23, 16 }
  0x2e   : > { %373 = vmatprep.subr.mxu0 %v344_v9  ;;  %1586 = vmatpush3.msra.mxu1 %v460_v19  ;;  %v334_v26 = vld [vmem:[%s2532_s1 + $0x68] sm:$0xff]  ;;  %v458_v27 = vld [vmem:[%s2534_s3 + $0x60] sm:$0xff]  ;;  %v332_v30 = vld [vmem:[%s2532_s1 + $0x58] sm:$0xff]  ;;  %p2027_p11 = scmp.ne.s32.totalorder %s1487_s23, %s2026_s15  ;;  %s2030_s19 = sshll.u32 %s2113_s18, 4  ;;  %s2031_s19 = int_to_ptr.vmem [resolvable:$false] %s2030_s19 }
  0x2f   : > { %374 = vmatpush1.msra.mxu0 %v343_v10  ;;  %1587 = vmatprep.subr.mxu1 %v475_v21  ;;  %v333_v28 = vld [vmem:[%s2532_s1 + $0x60] sm:$0xff]  ;;  %v457_v31 = vld [vmem:[%s2534_s3 + $0x58] sm:$0xff]  ;;  %v331_v32 = vld [vmem:[%s2532_s1 + $0x50] sm:$0xff]  ;;  %p2033_p0 = scmp.lt.s32.totalorder %s1487_s23, %s2031_s19 }
  0x30   : > { %375 = vmatprep.subr.mxu0 %v342_v11  ;;  %1588 = vmatpush3.msra.mxu1 %v459_v23  ;;  %v472_v33 = vld [vmem:[%s2534_s3 + $0xd0] sm:$0xff]  ;;  %v330_v34 = vld [vmem:[%s2532_s1 + $0x48] sm:$0xff]  ;;  %v329_v36 = vld [vmem:[%s2532_s1 + $0x40] sm:$0xff]  ;;  %p2028_p12 = pnand %p2027_p11, %p2194_p4 }
  0x31   : > { %376 = vmatpush1.msra.mxu0 %v341_v12  ;;  %1589 = vmatprep.subr.mxu1 %v474_v25  ;;  %v456_v35 = vld [vmem:[%s2534_s3 + $0x50] sm:$0xff]  ;;  %v328_v37 = vld [vmem:[%s2532_s1 + $0x38] sm:$0xff]  ;;  %v326_v39 = vld [vmem:[%s2532_s1 + $0x28] sm:$0xff] }
  0x32   : > { %377 = vmatprep.subr.mxu0 %v340_v13  ;;  %1590 = vmatpush3.msra.mxu1 %v458_v27  ;;  %v327_v38 = vld [vmem:[%s2532_s1 + $0x30] sm:$0xff]  ;;  %v325_v40 = vld [vmem:[%s2532_s1 + $0x20] sm:$0xff]  ;;  %v324_v41 = vld [vmem:[%s2532_s1 + $0x18] sm:$0xff]  ;;  %p2029_p13 = pneg %p2028_p12 }
  0x33   : > { %378 = vmatpush1.msra.mxu0 %v339_v14  ;;  %1591 = vmatprep.subr.mxu1 %v473_v29  ;;  %v323_v42 = vld [vmem:[%s2532_s1 + $0x10] sm:$0xff]  ;;  %v322_v43 = vld [vmem:[%s2532_s1 + $0x8] sm:$0xff]  ;;  %v321_v44 = vld [vmem:[%s2532_s1] sm:$0xff] }
  0x34   : > { %379 = vmatprep.subr.mxu0 %v338_v17  ;;  %1592 = vmatpush3.msra.mxu1 %v457_v31  ;;  %v319_v45 = vld [vmem:[%s317_s22] sm:$0xff]  ;;  %v320_v46 = vld [vmem:[%s317_s22 + $0x8] sm:$0xff]  ;;  %v469_v51 = vld [vmem:[%s2534_s3 + $0xb8] sm:$0xff]  ;;  %s1579_s22 = sshll.u32 %s2098_s27, 4  ;;  %s2032_s27 = scalar_lea.vmem %s2031_s19, 32 }
  0x35   : > { %380 = vmatpush1.msra.mxu0 %v337_v20  ;;  %1593 = vmatprep.subr.mxu1 %v472_v33  ;;  %v471_v47 = vld [vmem:[%s2534_s3 + $0xc8] sm:$0xff]  ;;  %v470_v49 = vld [vmem:[%s2534_s3 + $0xc0] sm:$0xff]  ;;  %v453_v52 = vld [vmem:[%s2534_s3 + $0x38] sm:$0xff]  ;;  %s1484_s8 = scalar_lea.hbm %s2538_s7, %s1579_s22  ;;  %p2034_p1 = scmp.lt.s32.totalorder %s2032_s27, %s2026_s15 }
  0x36   : > { %381 = vmatprep.subr.mxu0 %v336_v22  ;;  %1594 = vmatpush3.msra.mxu1 %v456_v35  ;;  %v455_v48 = vld [vmem:[%s2534_s3 + $0x48] sm:$0xff]  ;;  %v454_v50 = vld [vmem:[%s2534_s3 + $0x40] sm:$0xff]  ;;  %v468_v53 = vld [vmem:[%s2534_s3 + $0xb0] sm:$0xff] }
  0x37   : > { %382 = vmatpush1.msra.mxu0 %v335_v24  ;;  %1595 = vmatprep.subr.mxu1 %v471_v47  ;;  %v452_v54 = vld [vmem:[%s2534_s3 + $0x30] sm:$0xff]  ;;  %v467_v55 = vld [vmem:[%s2534_s3 + $0xa8] sm:$0xff]  ;;  %v466_v57 = vld [vmem:[%s2534_s3 + $0xa0] sm:$0xff]  ;;  %p2035_p2 = por %p2034_p1, %p2033_p0 }
  0x38   : > { %383 = vmatprep.subr.mxu0 %v334_v26  ;;  %1596 = vmatpush3.msra.mxu1 %v455_v48  ;;  %v451_v56 = vld [vmem:[%s2534_s3 + $0x28] sm:$0xff]  ;;  %v450_v58 = vld [vmem:[%s2534_s3 + $0x20] sm:$0xff]  ;;  %v465_v59 = vld [vmem:[%s2534_s3 + $0x98] sm:$0xff] }
  0x39   : > { %384 = vmatpush1.msra.mxu0 %v333_v28  ;;  %1597 = vmatprep.subr.mxu1 %v470_v49  ;;  %v449_v60 = vld [vmem:[%s2534_s3 + $0x18] sm:$0xff]  ;;  %v464_v61 = vld [vmem:[%s2534_s3 + $0x90] sm:$0xff]  ;;  %v463_v63 = vld [vmem:[%s2534_s3 + $0x88] sm:$0xff]  ;;  %p2036_p3 = pnand %p2035_p2, %p2029_p13 }
  0x3a   : > { %385 = vmatprep.subr.mxu0 %v332_v30  ;;  %1598 = vmatpush3.msra.mxu1 %v454_v50  ;;  %v448_v62 = vld [vmem:[%s2534_s3 + $0x10] sm:$0xff]  ;;  %v447_v1 = vld [vmem:[%s2534_s3 + $0x8] sm:$0xff]  ;;  %v462_v2 = vld [vmem:[%s2534_s3 + $0x80] sm:$0xff] }
  0x3b   : > { %386 = vmatpush1.msra.mxu0 %v331_v32  ;;  %1599 = vmatprep.subr.mxu1 %v469_v51  ;;  %v446_v3 = vld [vmem:[%s2534_s3] sm:$0xff]  ;;  %v734_v23 = vld [vmem:[#allocation3 + $0x1f8] sm:$0xff]  ;;  %v733_v26 = vld [vmem:[#allocation3 + $0x1f0] sm:$0xff] }
  0x3c   : > { %387 = vmatprep.subr.mxu0 %v330_v34  ;;  %1600 = vmatpush3.msra.mxu1 %v453_v52  ;;  %v353_v7 = vld [vmem:[%s2533_s2] sm:$0x3]  ;;  %v718_v24 = vld [vmem:[#allocation3 + $0x178] sm:$0xff]  ;;  %v717_v28 = vld [vmem:[#allocation3 + $0x170] sm:$0xff] }
  0x3d   : > { %388 = vmatpush1.msra.mxu0 %v329_v36  ;;  %1601 = vmatprep.subr.mxu1 %v468_v53  ;;  %v358_v9 = vrot.slane %v353_v7, %v357_v6  ;;  %v362_v10 = vrot.slane %v353_v7, %v361_v8  ;;  %v702_v25 = vld [vmem:[#allocation3 + $0xf8] sm:$0xff]  ;;  %v701_v29 = vld [vmem:[#allocation3 + $0xf0] sm:$0xff]  ;;  %v732_v30 = vld [vmem:[#allocation3 + $0x1e8] sm:$0xff] }
  0x3e   : > { %389 = vmatprep.subr.mxu0 %v328_v37  ;;  %1602 = vmatpush3.msra.mxu1 %v452_v54  ;;  %v686_v27 = vld [vmem:[#allocation3 + $0x78] sm:$0xff]  ;;  %v685_v31 = vld [vmem:[#allocation3 + $0x70] sm:$0xff]  ;;  %v716_v32 = vld [vmem:[#allocation3 + $0x168] sm:$0xff] }
  0x3f   : > { %390 = vmatpush1.msra.mxu0 %v327_v38  ;;  %1603 = vmatprep.subr.mxu1 %v467_v55  ;;  %v700_v33 = vld [vmem:[#allocation3 + $0xe8] sm:$0xff]  ;;  %v731_v34 = vld [vmem:[#allocation3 + $0x1e0] sm:$0xff]  ;;  %v726_v55 = vld [vmem:[#allocation3 + $0x1b8] sm:$0xff] }
  0x40   : > { %391 = vmatprep.subr.mxu0 %v326_v39  ;;  %1604 = vmatpush3.msra.mxu1 %v451_v56  ;;  %v684_v35 = vld [vmem:[#allocation3 + $0x68] sm:$0xff]  ;;  %v699_v36 = vld [vmem:[#allocation3 + $0xe0] sm:$0xff]  ;;  %v730_v39 = vld [vmem:[#allocation3 + $0x1d8] sm:$0xff] }
  0x41   : > { %392 = vmatpush1.msra.mxu0 %v325_v40  ;;  %1605 = vmatprep.subr.mxu1 %v466_v57  ;;  %v715_v37 = vld [vmem:[#allocation3 + $0x160] sm:$0xff]  ;;  %v698_v40 = vld [vmem:[#allocation3 + $0xd8] sm:$0xff]  ;;  %v728_v47 = vld [vmem:[#allocation3 + $0x1c8] sm:$0xff] }
  0x42   : > { %393 = vmatprep.subr.mxu0 %v324_v41  ;;  %1606 = vmatpush3.msra.mxu1 %v450_v58  ;;  %v683_v38 = vld [vmem:[#allocation3 + $0x60] sm:$0xff]  ;;  %v714_v41 = vld [vmem:[#allocation3 + $0x158] sm:$0xff]  ;;  %v696_v48 = vld [vmem:[#allocation3 + $0xc8] sm:$0xff] }
  0x43   : > { %394 = vmatpush1.msra.mxu0 %v323_v42  ;;  %1607 = vmatprep.subr.mxu1 %v465_v59  ;;  %v682_v42 = vld [vmem:[#allocation3 + $0x58] sm:$0xff]  ;;  %v712_v49 = vld [vmem:[#allocation3 + $0x148] sm:$0xff]  ;;  %v727_v51 = vld [vmem:[#allocation3 + $0x1c0] sm:$0xff] }
  0x44   : > { %395 = vmatprep.subr.mxu0 %v322_v43  ;;  %1608 = vmatpush3.msra.mxu1 %v449_v60  ;;  %v729_v43 = vld [vmem:[#allocation3 + $0x1d0] sm:$0xff]  ;;  %v680_v50 = vld [vmem:[#allocation3 + $0x48] sm:$0xff]  ;;  %v695_v52 = vld [vmem:[#allocation3 + $0xc0] sm:$0xff] }
  0x45   : > { %396 = vmatpush1.msra.mxu0 %v321_v44  ;;  %1609 = vmatprep.subr.mxu1 %v464_v61  ;;  %v697_v44 = vld [vmem:[#allocation3 + $0xd0] sm:$0xff]  ;;  %v711_v53 = vld [vmem:[#allocation3 + $0x140] sm:$0xff]  ;;  %v694_v56 = vld [vmem:[#allocation3 + $0xb8] sm:$0xff] }
  0x46   : > { %430 = vmatmul.mubr.f32.vlgmr.msra.gmra.mxu0 %v319_v45  ;;  %1610 = vmatpush3.msra.mxu1 %v448_v62  ;;  %v713_v45 = vld [vmem:[#allocation3 + $0x150] sm:$0xff]  ;;  %v679_v54 = vld [vmem:[#allocation3 + $0x40] sm:$0xff]  ;;  %v710_v57 = vld [vmem:[#allocation3 + $0x138] sm:$0xff] }
  0x47   : > { %435 = vmatprep.mubr.f32.mxu0 %v2111_v0  ;;  %1611 = vmatprep.subr.mxu1 %v463_v63  ;;  %v678_v58 = vld [vmem:[#allocation3 + $0x38] sm:$0xff]  ;;  %v725_v59 = vld [vmem:[#allocation3 + $0x1b0] sm:$0xff]  ;;  %v724_v63 = vld [vmem:[#allocation3 + $0x1a8] sm:$0xff] }
  0x48   : > { %1612 = vmatpush3.msra.mxu1 %v447_v1  ;;  %1621 = vmatprep.subr.mxu0 %v702_v25  ;;  %v693_v60 = vld [vmem:[#allocation3 + $0xb0] sm:$0xff]  ;;  %v692_v1 = vld [vmem:[#allocation3 + $0xa8] sm:$0xff]  ;;  %v723_v4 = vld [vmem:[#allocation3 + $0x1a0] sm:$0xff] }
  0x49   : > { %1613 = vmatprep.subr.mxu1 %v462_v2  ;;  %1622 = vmatpush3.msra.mxu0 %v686_v27  ;;  %v709_v61 = vld [vmem:[#allocation3 + $0x130] sm:$0xff]  ;;  %v708_v2 = vld [vmem:[#allocation3 + $0x128] sm:$0xff]  ;;  %v691_v5 = vld [vmem:[#allocation3 + $0xa0] sm:$0xff] }
  0x4a   : > { %436 = vmatmul.mubr.f32.gmra.mxu0 %v320_v46  ;;  %1614 = vmatpush3.msra.mxu1 %v446_v3  ;;  %v681_v46 = vld [vmem:[#allocation3 + $0x50] sm:$0xff]  ;;  %v676_v3 = vld [vmem:[#allocation3 + $0x28] sm:$0xff]  ;;  %v707_v6 = vld [vmem:[#allocation3 + $0x120] sm:$0xff] }
  0x4b   : > { %1656 = vmatprep.subr.mxu1 %v734_v23  ;;  %1623 = vmatprep.subr.mxu0 %v701_v29  ;;  %v677_v62 = vld [vmem:[#allocation3 + $0x30] sm:$0xff]  ;;  %v675_v7 = vld [vmem:[#allocation3 + $0x20] sm:$0xff]  ;;  %v722_v8 = vld [vmem:[#allocation3 + $0x198] sm:$0xff] }
  0x4c   : > { %1624 = vmatpush3.msra.mxu0 %v685_v31  ;;  %v798_v23 = vld [vmem:[#allocation3 + $0x3f8] sm:$0xff]  ;;  %v1578_v27 = vld [vmem:[%s2535_s4] ss:$0 sm:$0xff] }
  0x4d   : > { %1625 = vmatprep.subr.mxu0 %v700_v33  ;;  %v766_v25 = vld [vmem:[#allocation3 + $0x2f8] sm:$0xff] }
  0x4e   : > { %1626 = vmatpush3.msra.mxu0 %v684_v35 }
  0x4f   : > { %1627 = vmatprep.subr.mxu0 %v699_v36 }
  0x50   : > { %1628 = vmatpush3.msra.mxu0 %v683_v38 }
  0x51   : > { %1629 = vmatprep.subr.mxu0 %v698_v40 }
  0x52   : > { %1630 = vmatpush3.msra.mxu0 %v682_v42 }
  0x53   : > { %1631 = vmatprep.subr.mxu0 %v697_v44 }
  0x54   : > { %1632 = vmatpush3.msra.mxu0 %v681_v46 }
  0x55   : > { %1633 = vmatprep.subr.mxu0 %v696_v48 }
  0x56   : > { %1634 = vmatpush3.msra.mxu0 %v680_v50 }
  0x57   : > { %1635 = vmatprep.subr.mxu0 %v695_v52 }
  0x58   : > { %1636 = vmatpush3.msra.mxu0 %v679_v54 }
  0x59   : > { %1637 = vmatprep.subr.mxu0 %v694_v56 }
  0x5a   : > { %1638 = vmatpush3.msra.mxu0 %v678_v58 }
  0x5b   : > { %1639 = vmatprep.subr.mxu0 %v693_v60 }
  0x5c   : > { %1640 = vmatpush3.msra.mxu0 %v677_v62 }
  0x5d   : > { %1641 = vmatprep.subr.mxu0 %v692_v1 }
  0x5e   : > { %1642 = vmatpush3.msra.mxu0 %v676_v3 }
  0x5f   : > { %1643 = vmatprep.subr.mxu0 %v691_v5 }
  0x60   : > { %1644 = vmatpush3.msra.mxu0 %v675_v7 }
 0x106   : > { %v431_v11 = vpop.f32.mrf.mxu0 }
 0x107   : > { %v432_v12 = vadd.f32 %v431_v11, %v358_v9  ;;  %v674_v11 = vld [vmem:[#allocation3 + $0x18] sm:$0xff] }
 0x108   : > { %v433_v13 = vpop.f32.mrf.mxu0 }
 0x109   : > { %v434_v14 = vadd.f32 %v433_v13, %v362_v10  ;;  %v705_v13 = vld [vmem:[#allocation3 + $0x110] sm:$0xff] }
 0x10a   : > { %v437_v15 = vpop.f32.mrf.mxu0 }
 0x10b   : > { %1988 = vtanh.f32 %v434_v14  ;;  %v438_v16 = vadd.f32 %v437_v15, %v358_v9  ;;  %v690_v9 = vld [vmem:[#allocation3 + $0x98] sm:$0xff]  ;;  %v689_v14 = vld [vmem:[#allocation3 + $0x90] sm:$0xff]  ;;  %v720_v15 = vld [vmem:[#allocation3 + $0x188] sm:$0xff] }
 0x10c   : > { %1990 = vtanh.f32 %v432_v12  ;;  %v439_v17 = vpop.f32.mrf.mxu0  ;;  %v721_v12 = vld [vmem:[#allocation3 + $0x190] sm:$0xff]  ;;  %1645 = vmatprep.subr.mxu0 %v690_v9 }
 0x10d   : > { %v440_v18 = vadd.f32 %v439_v17, %v362_v10  ;;  %v706_v10 = vld [vmem:[#allocation3 + $0x118] sm:$0xff]  ;;  %1646 = vmatpush3.msra.mxu0 %v674_v11  ;;  %v704_v17 = vld [vmem:[#allocation3 + $0x108] sm:$0xff] }
 0x10e   : > { %1647 = vmatprep.subr.mxu0 %v689_v14 }
 0x10f   : > { %1992 = vtanh.f32 %v440_v18  ;;  %v688_v18 = vld [vmem:[#allocation3 + $0x88] sm:$0xff] }
 0x110   : > { %1994 = vtanh.f32 %v438_v16  ;;  %v673_v16 = vld [vmem:[#allocation3 + $0x10] sm:$0xff] }
 0x111   : > { %1648 = vmatpush3.msra.mxu0 %v673_v16 }
 0x112   : > { %1649 = vmatprep.subr.mxu0 %v688_v18 }
 0x118   : > { %v1989_v19 = vpop.eup %1988 }
 0x119   : > { %v1991_v20 = vpop.eup %1990  ;;  %549 = vmatprep.mubr.f32.mxu1 %v1989_v19  ;;  %v719_v19 = vld [vmem:[#allocation3 + $0x180] sm:$0xff] }
 0x11a   : > { %550 = vmatmul.mubr.f32.vlgmr.msra.gmra.mxu1 %v1991_v20  ;;  %v672_v20 = vld [vmem:[#allocation3 + $0x8] sm:$0xff] }
 0x11b   : > { %1657 = vmatpush3.msra.mxu1 %v718_v24  ;;  %1650 = vmatpush3.msra.mxu0 %v672_v20  ;;  %v671_v24 = vld [vmem:[#allocation3] sm:$0xff] }
 0x11c   : > { %v1993_v21 = vpop.eup %1992  ;;  %1658 = vmatprep.subr.mxu1 %v733_v26 }
 0x11d   : > { %v1995_v22 = vpop.eup %1994  ;;  %554 = vmatprep.mubr.f32.mxu1 %v1993_v21  ;;  %1659 = vmatpush3.msra.mxu1 %v717_v28  ;;  %v703_v21 = vld [vmem:[#allocation3 + $0x100] sm:$0xff] }
 0x11e   : > { %555 = vmatmul.mubr.f32.gmra.mxu1 %v1995_v22  ;;  %1660 = vmatprep.subr.mxu1 %v732_v30  ;;  %v687_v22 = vld [vmem:[#allocation3 + $0x80] sm:$0xff] }
 0x11f   : > { %1661 = vmatpush3.msra.mxu1 %v716_v32  ;;  %1651 = vmatprep.subr.mxu0 %v687_v22 }
 0x120   : > { %1662 = vmatprep.subr.mxu1 %v731_v34  ;;  %1652 = vmatpush3.msra.mxu0 %v671_v24 }
 0x121   : > { %1663 = vmatpush3.msra.mxu1 %v715_v37  ;;  %1691 = vmatprep.subr.mxu0 %v766_v25 }
 0x122   : > { %1664 = vmatprep.subr.mxu1 %v730_v39 }
 0x123   : > { %1665 = vmatpush3.msra.mxu1 %v714_v41 }
 0x124   : > { %1666 = vmatprep.subr.mxu1 %v729_v43 }
 0x125   : > { %1667 = vmatpush3.msra.mxu1 %v713_v45 }
 0x126   : > { %1668 = vmatprep.subr.mxu1 %v728_v47 }
 0x127   : > { %1669 = vmatpush3.msra.mxu1 %v712_v49 }
 0x128   : > { %1670 = vmatprep.subr.mxu1 %v727_v51 }
 0x129   : > { %1671 = vmatpush3.msra.mxu1 %v711_v53 }
 0x12a   : > { %1672 = vmatprep.subr.mxu1 %v726_v55 }
 0x12b   : > { %1673 = vmatpush3.msra.mxu1 %v710_v57 }
 0x12c   : > { %1674 = vmatprep.subr.mxu1 %v725_v59 }
 0x12d   : > { %1675 = vmatpush3.msra.mxu1 %v709_v61 }
 0x12e   : > { %1676 = vmatprep.subr.mxu1 %v724_v63 }
 0x12f   : > { %1677 = vmatpush3.msra.mxu1 %v708_v2 }
 0x130   : > { %1678 = vmatprep.subr.mxu1 %v723_v4 }
 0x131   : > { %1679 = vmatpush3.msra.mxu1 %v707_v6 }
 0x132   : > { %1680 = vmatprep.subr.mxu1 %v722_v8 }
 0x133   : > { %1681 = vmatpush3.msra.mxu1 %v706_v10 }
 0x134   : > { %1682 = vmatprep.subr.mxu1 %v721_v12 }
 0x135   : > { %1683 = vmatpush3.msra.mxu1 %v705_v13 }
 0x136   : > { %1684 = vmatprep.subr.mxu1 %v720_v15 }
 0x137   : > { %1685 = vmatpush3.msra.mxu1 %v704_v17 }
 0x138   : > { %1686 = vmatprep.subr.mxu1 %v719_v19 }
 0x139   : > { %1687 = vmatpush3.msra.mxu1 %v703_v21 }
 0x13a   : > { %1726 = vmatprep.subr.mxu1 %v798_v23 }
 0x1da   : > { %v1615_v26 = vpop.f32.mrf.mxu1 }
 0x1dc   : > { %v1616_v28 = vpop.f32.mrf.mxu1 }
 0x1dd   : > { %v1617_v29 = vadd.f32 %v1616_v28, %v1615_v26 }
 0x1de   : > { %v1618_v30 = vpop.f32.mrf.mxu1 }
 0x1df   : > { %v552_v31 = vadd.f32 %v1617_v29, %v1578_v27 }
 0x1e0   : > { %v1619_v32 = vpop.f32.mrf.mxu1 }
 0x1e1   : > { %1996 = vtanh.f32 %v552_v31  ;;  %v1620_v33 = vadd.f32 %v1619_v32, %v1618_v30 }
 0x1e3   : > { %v557_v34 = vadd.f32 %v1620_v33, %v1578_v27 }
 0x1e5   : > { %1998 = vtanh.f32 %v557_v34 }
 0x1ee   : > { %v1997_v35 = vpop.eup %1996 }
 0x1ef   : > { %v563_v36 = vsel %vm562_vm0, %v1997_v35, -inf  ;;  %v571_v37 = vsel %vm570_vm1, %v1997_v35, -inf  ;;  %v579_v38 = vsel %vm578_vm2, %v1997_v35, -inf  ;;  %v587_v39 = vsel %vm586_vm3, %v1997_v35, -inf }
 0x1f0   : > { %v564_v40 = vrot.slane %v563_v36, 4  ;;  %v572_v41 = vrot.slane %v571_v37, 4  ;;  %v580_v42 = vrot.slane %v579_v38, 4  ;;  %v588_v43 = vrot.slane %v587_v39, 4 }
 0x1f2   : > { %v1999_v44 = vpop.eup %1998  ;;  %v565_v45 = vmax.f32 %v563_v36, %v564_v40  ;;  %v573_v46 = vmax.f32 %v571_v37, %v572_v41  ;;  %v581_v47 = vmax.f32 %v579_v38, %v580_v42  ;;  %v589_v48 = vmax.f32 %v587_v39, %v588_v43  ;;  %v782_v42 = vld [vmem:[#allocation3 + $0x378] sm:$0xff]  ;;  %v797_v43 = vld [vmem:[#allocation3 + $0x3f0] sm:$0xff] }
 0x1f3   : > { %v594_v49 = vsel %vm562_vm0, %v1999_v44, -inf  ;;  %v601_v50 = vsel %vm570_vm1, %v1999_v44, -inf  ;;  %v608_v51 = vsel %vm578_vm2, %v1999_v44, -inf  ;;  %v615_v52 = vsel %vm586_vm3, %v1999_v44, -inf }
 0x1f4   : > { %v566_v53 = vrot.slane %v565_v45, 2  ;;  %v574_v54 = vrot.slane %v573_v46, 2  ;;  %v582_v55 = vrot.slane %v581_v47, 2  ;;  %v590_v56 = vrot.slane %v589_v48, 2 }
 0x1f5   : > { %v595_v57 = vrot.slane %v594_v49, 4  ;;  %v602_v58 = vrot.slane %v601_v50, 4  ;;  %v609_v59 = vrot.slane %v608_v51, 4  ;;  %v616_v60 = vrot.slane %v615_v52, 4 }
 0x1f6   : > { %v567_v61 = vmax.f32 %v565_v45, %v566_v53  ;;  %v575_v62 = vmax.f32 %v573_v46, %v574_v54  ;;  %v583_v63 = vmax.f32 %v581_v47, %v582_v55  ;;  %v591_v1 = vmax.f32 %v589_v48, %v590_v56  ;;  %v750_v45 = vld [vmem:[#allocation3 + $0x278] sm:$0xff]  ;;  %v781_v46 = vld [vmem:[#allocation3 + $0x370] sm:$0xff]  ;;  %v795_v53 = vld [vmem:[#allocation3 + $0x3e0] sm:$0xff] }
 0x1f7   : > { %v596_v2 = vmax.f32 %v594_v49, %v595_v57  ;;  %v603_v3 = vmax.f32 %v601_v50, %v602_v58  ;;  %v610_v4 = vmax.f32 %v608_v51, %v609_v59  ;;  %v617_v5 = vmax.f32 %v615_v52, %v616_v60  ;;  %v765_v47 = vld [vmem:[#allocation3 + $0x2f0] sm:$0xff]  ;;  %v796_v49 = vld [vmem:[#allocation3 + $0x3e8] sm:$0xff]  ;;  %v779_v55 = vld [vmem:[#allocation3 + $0x360] sm:$0xff] }
 0x1f8   : > { %v568_v6 = vrot.slane %v567_v61, 1  ;;  %v576_v7 = vrot.slane %v575_v62, 1  ;;  %v584_v8 = vrot.slane %v583_v63, 1  ;;  %v592_v16 = vrot.slane %v591_v1, 1  ;;  %v749_v50 = vld [vmem:[#allocation3 + $0x270] sm:$0xff]  ;;  %v780_v51 = vld [vmem:[#allocation3 + $0x368] sm:$0xff] }
 0x1f9   : > { %v597_v9 = vrot.slane %v596_v2, 2  ;;  %v604_v10 = vrot.slane %v603_v3, 2  ;;  %v611_v11 = vrot.slane %v610_v4, 2  ;;  %v618_v12 = vrot.slane %v617_v5, 2  ;;  %v764_v52 = vld [vmem:[#allocation3 + $0x2e8] sm:$0xff]  ;;  %v763_v56 = vld [vmem:[#allocation3 + $0x2e0] sm:$0xff] }
 0x1fa   : > { %v569_v13 = vmax.f32 %v567_v61, %v568_v6  ;;  %v577_v14 = vmax.f32 %v575_v62, %v576_v7  ;;  %v585_v15 = vmax.f32 %v583_v63, %v584_v8  ;;  %v593_v25 = vmax.f32 %v591_v1, %v592_v16  ;;  %v748_v54 = vld [vmem:[#allocation3 + $0x268] sm:$0xff]  ;;  %v794_v57 = vld [vmem:[#allocation3 + $0x3d8] sm:$0xff]  ;;  %v747_v58 = vld [vmem:[#allocation3 + $0x260] sm:$0xff] }
 0x1fb   : > { %v598_v17 = vmax.f32 %v596_v2, %v597_v9  ;;  %v605_v18 = vmax.f32 %v603_v3, %v604_v10  ;;  %v612_v19 = vmax.f32 %v610_v4, %v611_v11  ;;  %v619_v20 = vmax.f32 %v617_v5, %v618_v12  ;;  %v778_v59 = vld [vmem:[#allocation3 + $0x358] sm:$0xff]  ;;  %v793_v61 = vld [vmem:[#allocation3 + $0x3d0] sm:$0xff]  ;;  %v792_v2 = vld [vmem:[#allocation3 + $0x3c8] sm:$0xff] }
 0x1fc   : > { %v623_v21 = vsel %vm622_vm4, %v569_v13, %v577_v14  ;;  %v762_v60 = vld [vmem:[#allocation3 + $0x2d8] sm:$0xff]  ;;  %v777_v63 = vld [vmem:[#allocation3 + $0x350] sm:$0xff]  ;;  %v776_v4 = vld [vmem:[#allocation3 + $0x348] sm:$0xff] }
 0x1fd   : > { %v599_v22 = vrot.slane %v598_v17, 1  ;;  %v606_v23 = vrot.slane %v605_v18, 1  ;;  %v613_v24 = vrot.slane %v612_v19, 1  ;;  %v620_v26 = vrot.slane %v619_v20, 1  ;;  %v746_v62 = vld [vmem:[#allocation3 + $0x258] sm:$0xff]  ;;  %v761_v1 = vld [vmem:[#allocation3 + $0x2d0] sm:$0xff] }
 0x1fe   : > { %v624_v27 = vsel %vm562_vm0, %v623_v21, %v585_v15  ;;  %v745_v3 = vld [vmem:[#allocation3 + $0x250] sm:$0xff]  ;;  %v760_v5 = vld [vmem:[#allocation3 + $0x2c8] sm:$0xff]  ;;  %v791_v6 = vld [vmem:[#allocation3 + $0x3c0] sm:$0xff] }
 0x1ff   : > { %v600_v28 = vmax.f32 %v598_v17, %v599_v22  ;;  %v607_v29 = vmax.f32 %v605_v18, %v606_v23  ;;  %v626_v30 = vsel %vm625_vm5, %v624_v27, %v593_v25  ;;  %v614_v31 = vmax.f32 %v612_v19, %v613_v24  ;;  %v744_v7 = vld [vmem:[#allocation3 + $0x248] sm:$0xff]  ;;  %v775_v8 = vld [vmem:[#allocation3 + $0x340] sm:$0xff]  ;;  %v790_v10 = vld [vmem:[#allocation3 + $0x3b8] sm:$0xff] }
 0x200   : > { %v621_v33 = vmax.f32 %v619_v20, %v620_v26  ;;  %v759_v9 = vld [vmem:[#allocation3 + $0x2c0] sm:$0xff]  ;;  %v774_v12 = vld [vmem:[#allocation3 + $0x338] sm:$0xff]  ;;  %v789_v14 = vld [vmem:[#allocation3 + $0x3b0] sm:$0xff] }
 0x201   : > { %v628_v32 = vsel %vm627_vm6, %v626_v30, %v600_v28  ;;  %v743_v11 = vld [vmem:[#allocation3 + $0x240] sm:$0xff]  ;;  %v758_v13 = vld [vmem:[#allocation3 + $0x2b8] sm:$0xff]  ;;  %v773_v16 = vld [vmem:[#allocation3 + $0x330] sm:$0xff] }
 0x202   : > { %v630_v34 = vsel %vm629_vm7, %v628_v32, %v607_v29  ;;  %v742_v15 = vld [vmem:[#allocation3 + $0x238] sm:$0xff]  ;;  %v757_v17 = vld [vmem:[#allocation3 + $0x2b0] sm:$0xff]  ;;  %v788_v18 = vld [vmem:[#allocation3 + $0x3a8] sm:$0xff] }
 0x203   : > { %v632_v35 = vsel %vm631_vm8, %v630_v34, %v614_v31  ;;  %v741_v19 = vld [vmem:[#allocation3 + $0x230] sm:$0xff]  ;;  %v772_v20 = vld [vmem:[#allocation3 + $0x328] sm:$0xff]  ;;  %v787_v22 = vld [vmem:[#allocation3 + $0x3a0] sm:$0xff] }
 0x204   : > { %v2446_v36 = vsel %vm633_vm9, %v632_v35, %v621_v33  ;;  %v756_v21 = vld [vmem:[#allocation3 + $0x2a8] sm:$0xff]  ;;  %v771_v24 = vld [vmem:[#allocation3 + $0x320] sm:$0xff]  ;;  %v786_v26 = vld [vmem:[#allocation3 + $0x398] sm:$0xff] }
 0x205   : > { %v644_v37 = vrot.slane %v2446_v36, 1  ;;  %v740_v23 = vld [vmem:[#allocation3 + $0x228] sm:$0xff]  ;;  %v755_v25 = vld [vmem:[#allocation3 + $0x2a0] sm:$0xff]  ;;  %v770_v28 = vld [vmem:[#allocation3 + $0x318] sm:$0xff] }
 0x206   : > { %v739_v27 = vld [vmem:[#allocation3 + $0x220] sm:$0xff]  ;;  %v754_v29 = vld [vmem:[#allocation3 + $0x298] sm:$0xff]  ;;  %v785_v30 = vld [vmem:[#allocation3 + $0x390] sm:$0xff] }
 0x207   : > { %v2452_v38 = vmax.f32 %v2446_v36, %v644_v37  ;;  %v738_v31 = vld [vmem:[#allocation3 + $0x218] sm:$0xff]  ;;  %v769_v32 = vld [vmem:[#allocation3 + $0x310] sm:$0xff]  ;;  %v784_v34 = vld [vmem:[#allocation3 + $0x388] sm:$0xff] }
 0x208   : > { %v753_v33 = vld [vmem:[#allocation3 + $0x290] sm:$0xff] }
 0x209   : > { %1046 = vmatprep.mubr.f32.mxu1 %v2452_v38  ;;  %v648_v39 = vrot.slane %v2452_v38, 2  ;;  %v655_v48 = vrot.slane %v2452_v38, 4  ;;  %v737_v35 = vld [vmem:[#allocation3 + $0x210] sm:$0xff] }
 0x20b   : > { %v650_v40 = vmax.f32 %v2452_v38, %v648_v39 }
 0x20d   : > { %v652_v41 = vrot.slane %v650_v40, 4  ;;  %976 = vmatprep.mubr.f32.mxu0 %v650_v40 }
 0x20f   : > { %v654_v44 = vmax.f32 %v650_v40, %v652_v41  ;;  %1047 = vmatmul.mubr.f32.vlgmr.msra.gmra.mxu1 %v652_v41  ;;  %v768_v40 = vld [vmem:[#allocation3 + $0x308] sm:$0xff] }
 0x210   : > { %1727 = vmatpush3.msra.mxu1 %v782_v42  ;;  %1186 = vmatprep.mubr.f32.mxu1 %v2446_v36  ;;  %v752_v41 = vld [vmem:[#allocation3 + $0x288] sm:$0xff]  ;;  %v783_v42 = vld [vmem:[#allocation3 + $0x380] sm:$0xff] }
 0x211   : > { %1728 = vmatprep.subr.mxu1 %v797_v43  ;;  %977 = vmatmul.mubr.f32.vlgmr.msra.gmra.mxu0 %v654_v44  ;;  %v736_v43 = vld [vmem:[#allocation3 + $0x208] sm:$0xff]  ;;  %v767_v44 = vld [vmem:[#allocation3 + $0x300] sm:$0xff] }
 0x212   : > { %1692 = vmatpush3.msra.mxu0 %v750_v45  ;;  %1729 = vmatpush3.msra.mxu1 %v781_v46  ;;  %v751_v45 = vld [vmem:[#allocation3 + $0x280] sm:$0xff]  ;;  %v862_v46 = vld [vmem:[#allocation3 + $0x5f8] sm:$0xff] }
 0x213   : > { %1693 = vmatprep.subr.mxu0 %v765_v47  ;;  %1116 = vmatprep.mubr.f32.mxu0 %v655_v48  ;;  %v657_v47 = vrot.slane %v2452_v38, 6  ;;  %v735_v48 = vld [vmem:[#allocation3 + $0x200] sm:$0xff] }
 0x214   : > { %1730 = vmatprep.subr.mxu1 %v796_v49  ;;  %1694 = vmatpush3.msra.mxu0 %v749_v50  ;;  %v846_v49 = vld [vmem:[#allocation3 + $0x578] sm:$0xff]  ;;  %v663_v50 = vrot.slane %v2446_v36, 4  ;;  %v843_v38 = vld [vmem:[#allocation3 + $0x560] sm:$0xff] }
 0x215   : > { %1731 = vmatpush3.msra.mxu1 %v780_v51  ;;  %1695 = vmatprep.subr.mxu0 %v764_v52  ;;  %v830_v51 = vld [vmem:[#allocation3 + $0x4f8] sm:$0xff]  ;;  %v861_v52 = vld [vmem:[#allocation3 + $0x5f0] sm:$0xff] }
 0x216   : > { %1732 = vmatprep.subr.mxu1 %v795_v53  ;;  %1696 = vmatpush3.msra.mxu0 %v748_v54  ;;  %v814_v53 = vld [vmem:[#allocation3 + $0x478] sm:$0xff]  ;;  %v659_v54 = vrot.slane %v2446_v36, 2 }
 0x217   : > { %1733 = vmatpush3.msra.mxu1 %v779_v55  ;;  %1697 = vmatprep.subr.mxu0 %v763_v56  ;;  %v845_v55 = vld [vmem:[#allocation3 + $0x570] sm:$0xff] }
 0x218   : > { %1734 = vmatprep.subr.mxu1 %v794_v57  ;;  %1698 = vmatpush3.msra.mxu0 %v747_v58  ;;  %v829_v56 = vld [vmem:[#allocation3 + $0x4f0] sm:$0xff]  ;;  %v860_v57 = vld [vmem:[#allocation3 + $0x5e8] sm:$0xff] }
 0x219   : > { %1735 = vmatpush3.msra.mxu1 %v778_v59  ;;  %1699 = vmatprep.subr.mxu0 %v762_v60  ;;  %v813_v58 = vld [vmem:[#allocation3 + $0x470] sm:$0xff]  ;;  %v844_v59 = vld [vmem:[#allocation3 + $0x568] sm:$0xff] }
 0x21a   : > { %1736 = vmatprep.subr.mxu1 %v793_v61  ;;  %1700 = vmatpush3.msra.mxu0 %v746_v62  ;;  %v828_v60 = vld [vmem:[#allocation3 + $0x4e8] sm:$0xff]  ;;  %v859_v61 = vld [vmem:[#allocation3 + $0x5e0] sm:$0xff] }
 0x21b   : > { %1737 = vmatpush3.msra.mxu1 %v777_v63  ;;  %1701 = vmatprep.subr.mxu0 %v761_v1  ;;  %v812_v62 = vld [vmem:[#allocation3 + $0x468] sm:$0xff]  ;;  %v858_v63 = vld [vmem:[#allocation3 + $0x5d8] sm:$0xff]  ;;  %v811_v1 = vld [vmem:[#allocation3 + $0x460] sm:$0xff] }
 0x21c   : > { %1738 = vmatprep.subr.mxu1 %v792_v2  ;;  %1702 = vmatpush3.msra.mxu0 %v745_v3  ;;  %v842_v2 = vld [vmem:[#allocation3 + $0x558] sm:$0xff] }
 0x21d   : > { %1739 = vmatpush3.msra.mxu1 %v776_v4  ;;  %1703 = vmatprep.subr.mxu0 %v760_v5  ;;  %v826_v3 = vld [vmem:[#allocation3 + $0x4d8] sm:$0xff]  ;;  %v857_v4 = vld [vmem:[#allocation3 + $0x5d0] sm:$0xff] }
 0x21e   : > { %1740 = vmatprep.subr.mxu1 %v791_v6  ;;  %1704 = vmatpush3.msra.mxu0 %v744_v7  ;;  %v810_v5 = vld [vmem:[#allocation3 + $0x458] sm:$0xff]  ;;  %v841_v6 = vld [vmem:[#allocation3 + $0x550] sm:$0xff] }
 0x21f   : > { %1741 = vmatpush3.msra.mxu1 %v775_v8  ;;  %1705 = vmatprep.subr.mxu0 %v759_v9  ;;  %v825_v7 = vld [vmem:[#allocation3 + $0x4d0] sm:$0xff]  ;;  %v856_v8 = vld [vmem:[#allocation3 + $0x5c8] sm:$0xff] }
 0x220   : > { %1742 = vmatprep.subr.mxu1 %v790_v10  ;;  %1706 = vmatpush3.msra.mxu0 %v743_v11  ;;  %v809_v9 = vld [vmem:[#allocation3 + $0x450] sm:$0xff]  ;;  %v840_v10 = vld [vmem:[#allocation3 + $0x548] sm:$0xff] }
 0x221   : > { %1743 = vmatpush3.msra.mxu1 %v774_v12  ;;  %1707 = vmatprep.subr.mxu0 %v758_v13  ;;  %v824_v11 = vld [vmem:[#allocation3 + $0x4c8] sm:$0xff]  ;;  %v855_v12 = vld [vmem:[#allocation3 + $0x5c0] sm:$0xff] }
 0x222   : > { %1744 = vmatprep.subr.mxu1 %v789_v14  ;;  %1708 = vmatpush3.msra.mxu0 %v742_v15  ;;  %v808_v13 = vld [vmem:[#allocation3 + $0x448] sm:$0xff]  ;;  %v839_v14 = vld [vmem:[#allocation3 + $0x540] sm:$0xff] }
 0x223   : > { %1745 = vmatpush3.msra.mxu1 %v773_v16  ;;  %1709 = vmatprep.subr.mxu0 %v757_v17  ;;  %v823_v15 = vld [vmem:[#allocation3 + $0x4c0] sm:$0xff]  ;;  %v854_v16 = vld [vmem:[#allocation3 + $0x5b8] sm:$0xff] }
 0x224   : > { %1746 = vmatprep.subr.mxu1 %v788_v18  ;;  %1710 = vmatpush3.msra.mxu0 %v741_v19  ;;  %v807_v17 = vld [vmem:[#allocation3 + $0x440] sm:$0xff]  ;;  %v838_v18 = vld [vmem:[#allocation3 + $0x538] sm:$0xff] }
 0x225   : > { %1747 = vmatpush3.msra.mxu1 %v772_v20  ;;  %1711 = vmatprep.subr.mxu0 %v756_v21  ;;  %v822_v19 = vld [vmem:[#allocation3 + $0x4b8] sm:$0xff]  ;;  %v853_v20 = vld [vmem:[#allocation3 + $0x5b0] sm:$0xff] }
 0x226   : > { %1748 = vmatprep.subr.mxu1 %v787_v22  ;;  %1712 = vmatpush3.msra.mxu0 %v740_v23  ;;  %v806_v21 = vld [vmem:[#allocation3 + $0x438] sm:$0xff]  ;;  %v837_v22 = vld [vmem:[#allocation3 + $0x530] sm:$0xff] }
 0x227   : > { %1749 = vmatpush3.msra.mxu1 %v771_v24  ;;  %1713 = vmatprep.subr.mxu0 %v755_v25  ;;  %v821_v23 = vld [vmem:[#allocation3 + $0x4b0] sm:$0xff]  ;;  %v852_v24 = vld [vmem:[#allocation3 + $0x5a8] sm:$0xff] }
 0x228   : > { %1750 = vmatprep.subr.mxu1 %v786_v26  ;;  %1714 = vmatpush3.msra.mxu0 %v739_v27  ;;  %v805_v25 = vld [vmem:[#allocation3 + $0x430] sm:$0xff]  ;;  %v836_v26 = vld [vmem:[#allocation3 + $0x528] sm:$0xff] }
 0x229   : > { %1751 = vmatpush3.msra.mxu1 %v770_v28  ;;  %1715 = vmatprep.subr.mxu0 %v754_v29  ;;  %v820_v27 = vld [vmem:[#allocation3 + $0x4a8] sm:$0xff]  ;;  %v851_v28 = vld [vmem:[#allocation3 + $0x5a0] sm:$0xff] }
 0x22a   : > { %1752 = vmatprep.subr.mxu1 %v785_v30  ;;  %1716 = vmatpush3.msra.mxu0 %v738_v31  ;;  %v804_v29 = vld [vmem:[#allocation3 + $0x428] sm:$0xff]  ;;  %v835_v30 = vld [vmem:[#allocation3 + $0x520] sm:$0xff] }
 0x22b   : > { %1753 = vmatpush3.msra.mxu1 %v769_v32  ;;  %1717 = vmatprep.subr.mxu0 %v753_v33  ;;  %v819_v31 = vld [vmem:[#allocation3 + $0x4a0] sm:$0xff]  ;;  %v850_v32 = vld [vmem:[#allocation3 + $0x598] sm:$0xff] }
 0x22c   : > { %1754 = vmatprep.subr.mxu1 %v784_v34  ;;  %1718 = vmatpush3.msra.mxu0 %v737_v35  ;;  %v803_v33 = vld [vmem:[#allocation3 + $0x420] sm:$0xff]  ;;  %v834_v34 = vld [vmem:[#allocation3 + $0x518] sm:$0xff] }
 0x22d   : > { %1755 = vmatpush3.msra.mxu1 %v768_v40  ;;  %1719 = vmatprep.subr.mxu0 %v752_v41  ;;  %v818_v35 = vld [vmem:[#allocation3 + $0x498] sm:$0xff]  ;;  %v849_v40 = vld [vmem:[#allocation3 + $0x590] sm:$0xff] }
 0x22e   : > { %1756 = vmatprep.subr.mxu1 %v783_v42  ;;  %1720 = vmatpush3.msra.mxu0 %v736_v43  ;;  %v802_v41 = vld [vmem:[#allocation3 + $0x418] sm:$0xff]  ;;  %v833_v42 = vld [vmem:[#allocation3 + $0x510] sm:$0xff] }
 0x22f   : > { %1757 = vmatpush3.msra.mxu1 %v767_v44  ;;  %1721 = vmatprep.subr.mxu0 %v751_v45  ;;  %v817_v43 = vld [vmem:[#allocation3 + $0x490] sm:$0xff]  ;;  %v848_v44 = vld [vmem:[#allocation3 + $0x588] sm:$0xff] }
 0x230   : > { %1187 = vmatmul.mubr.f32.vlgmr.msra.gmra.mxu1 %v657_v47  ;;  %1796 = vmatprep.subr.mxu1 %v862_v46  ;;  %v801_v45 = vld [vmem:[#allocation3 + $0x410] sm:$0xff]  ;;  %v832_v46 = vld [vmem:[#allocation3 + $0x508] sm:$0xff] }
 0x231   : > { %1722 = vmatpush3.msra.mxu0 %v735_v48  ;;  %1797 = vmatpush3.msra.mxu1 %v846_v49  ;;  %v816_v47 = vld [vmem:[#allocation3 + $0x488] sm:$0xff]  ;;  %v847_v48 = vld [vmem:[#allocation3 + $0x580] sm:$0xff] }
 0x232   : > { %1326 = vmatprep.mubr.f32.mxu1 %v663_v50  ;;  %1117 = vmatmul.mubr.f32.vlgmr.msra.gmra.mxu0 %v648_v39  ;;  %v827_v39 = vld [vmem:[#allocation3 + $0x4e0] sm:$0xff]  ;;  %v800_v49 = vld [vmem:[#allocation3 + $0x408] sm:$0xff] }
 0x233   : > { %1761 = vmatprep.subr.mxu0 %v830_v51  ;;  %1798 = vmatprep.subr.mxu1 %v861_v52  ;;  %v831_v50 = vld [vmem:[#allocation3 + $0x500] sm:$0xff]  ;;  %v661_v52 = vrot.slane %v2446_v36, 3 }
 0x234   : > { %1762 = vmatpush3.msra.mxu0 %v814_v53  ;;  %1256 = vmatprep.mubr.f32.mxu0 %v659_v54  ;;  %v815_v51 = vld [vmem:[#allocation3 + $0x480] sm:$0xff]  ;;  %v910_v54 = vld [vmem:[#allocation3 + $0x778] sm:$0xff] }
 0x235   : > { %1799 = vmatpush3.msra.mxu1 %v845_v55  ;;  %1763 = vmatprep.subr.mxu0 %v829_v56  ;;  %v799_v53 = vld [vmem:[#allocation3 + $0x400] sm:$0xff]  ;;  %v894_v55 = vld [vmem:[#allocation3 + $0x6f8] sm:$0xff] }
 0x236   : > { %1800 = vmatprep.subr.mxu1 %v860_v57  ;;  %1764 = vmatpush3.msra.mxu0 %v813_v58  ;;  %v878_v56 = vld [vmem:[#allocation3 + $0x678] sm:$0xff]  ;;  %v909_v57 = vld [vmem:[#allocation3 + $0x770] sm:$0xff]  ;;  %v667_v58 = vrot.slane %v2446_v36, 6 }
 0x237   : > { %1801 = vmatpush3.msra.mxu1 %v844_v59  ;;  %1765 = vmatprep.subr.mxu0 %v828_v60  ;;  %v893_v59 = vld [vmem:[#allocation3 + $0x6f0] sm:$0xff] }
 0x238   : > { %1802 = vmatprep.subr.mxu1 %v859_v61  ;;  %1766 = vmatpush3.msra.mxu0 %v812_v62  ;;  %v877_v60 = vld [vmem:[#allocation3 + $0x670] sm:$0xff]  ;;  %v908_v61 = vld [vmem:[#allocation3 + $0x768] sm:$0xff] }
 0x239   : > { %1803 = vmatpush3.msra.mxu1 %v843_v38  ;;  %1767 = vmatprep.subr.mxu0 %v827_v39  ;;  %v892_v62 = vld [vmem:[#allocation3 + $0x6e8] sm:$0xff]  ;;  %v907_v39 = vld [vmem:[#allocation3 + $0x760] sm:$0xff] }
 0x23a   : > { %1804 = vmatprep.subr.mxu1 %v858_v63  ;;  %1768 = vmatpush3.msra.mxu0 %v811_v1  ;;  %v876_v38 = vld [vmem:[#allocation3 + $0x668] sm:$0xff]  ;;  %v875_v63 = vld [vmem:[#allocation3 + $0x660] sm:$0xff]  ;;  %v906_v1 = vld [vmem:[#allocation3 + $0x758] sm:$0xff] }
 0x23b   : > { %1805 = vmatpush3.msra.mxu1 %v842_v2  ;;  %1769 = vmatprep.subr.mxu0 %v826_v3  ;;  %v890_v2 = vld [vmem:[#allocation3 + $0x6d8] sm:$0xff] }
 0x23c   : > { %1806 = vmatprep.subr.mxu1 %v857_v4  ;;  %1770 = vmatpush3.msra.mxu0 %v810_v5  ;;  %v874_v3 = vld [vmem:[#allocation3 + $0x658] sm:$0xff]  ;;  %v905_v4 = vld [vmem:[#allocation3 + $0x750] sm:$0xff] }
 0x23d   : > { %1807 = vmatpush3.msra.mxu1 %v841_v6  ;;  %1771 = vmatprep.subr.mxu0 %v825_v7  ;;  %v889_v5 = vld [vmem:[#allocation3 + $0x6d0] sm:$0xff]  ;;  %v904_v7 = vld [vmem:[#allocation3 + $0x748] sm:$0xff] }
 0x23e   : > { %1808 = vmatprep.subr.mxu1 %v856_v8  ;;  %1772 = vmatpush3.msra.mxu0 %v809_v9  ;;  %v873_v6 = vld [vmem:[#allocation3 + $0x650] sm:$0xff]  ;;  %v888_v8 = vld [vmem:[#allocation3 + $0x6c8] sm:$0xff] }
 0x23f   : > { %1809 = vmatpush3.msra.mxu1 %v840_v10  ;;  %1773 = vmatprep.subr.mxu0 %v824_v11  ;;  %v872_v9 = vld [vmem:[#allocation3 + $0x648] sm:$0xff]  ;;  %v903_v10 = vld [vmem:[#allocation3 + $0x740] sm:$0xff] }
 0x240   : > { %1810 = vmatprep.subr.mxu1 %v855_v12  ;;  %1774 = vmatpush3.msra.mxu0 %v808_v13  ;;  %v887_v11 = vld [vmem:[#allocation3 + $0x6c0] sm:$0xff]  ;;  %v902_v13 = vld [vmem:[#allocation3 + $0x738] sm:$0xff] }
 0x241   : > { %1811 = vmatpush3.msra.mxu1 %v839_v14  ;;  %1775 = vmatprep.subr.mxu0 %v823_v15  ;;  %v871_v12 = vld [vmem:[#allocation3 + $0x640] sm:$0xff]  ;;  %v886_v14 = vld [vmem:[#allocation3 + $0x6b8] sm:$0xff] }
 0x242   : > { %1812 = vmatprep.subr.mxu1 %v854_v16  ;;  %1776 = vmatpush3.msra.mxu0 %v807_v17  ;;  %v870_v15 = vld [vmem:[#allocation3 + $0x638] sm:$0xff]  ;;  %v901_v16 = vld [vmem:[#allocation3 + $0x730] sm:$0xff] }
 0x243   : > { %1813 = vmatpush3.msra.mxu1 %v838_v18  ;;  %1777 = vmatprep.subr.mxu0 %v822_v19  ;;  %v885_v17 = vld [vmem:[#allocation3 + $0x6b0] sm:$0xff]  ;;  %v900_v19 = vld [vmem:[#allocation3 + $0x728] sm:$0xff] }
 0x244   : > { %1814 = vmatprep.subr.mxu1 %v853_v20  ;;  %1778 = vmatpush3.msra.mxu0 %v806_v21  ;;  %v869_v18 = vld [vmem:[#allocation3 + $0x630] sm:$0xff]  ;;  %v884_v20 = vld [vmem:[#allocation3 + $0x6a8] sm:$0xff] }
 0x245   : > { %1815 = vmatpush3.msra.mxu1 %v837_v22  ;;  %1779 = vmatprep.subr.mxu0 %v821_v23  ;;  %v868_v21 = vld [vmem:[#allocation3 + $0x628] sm:$0xff]  ;;  %v899_v22 = vld [vmem:[#allocation3 + $0x720] sm:$0xff] }
 0x246   : > { %1816 = vmatprep.subr.mxu1 %v852_v24  ;;  %1780 = vmatpush3.msra.mxu0 %v805_v25  ;;  %v883_v23 = vld [vmem:[#allocation3 + $0x6a0] sm:$0xff]  ;;  %v898_v25 = vld [vmem:[#allocation3 + $0x718] sm:$0xff] }
 0x247   : > { %1817 = vmatpush3.msra.mxu1 %v836_v26  ;;  %1781 = vmatprep.subr.mxu0 %v820_v27  ;;  %v867_v24 = vld [vmem:[#allocation3 + $0x620] sm:$0xff]  ;;  %v882_v26 = vld [vmem:[#allocation3 + $0x698] sm:$0xff] }
 0x248   : > { %1818 = vmatprep.subr.mxu1 %v851_v28  ;;  %1782 = vmatpush3.msra.mxu0 %v804_v29  ;;  %v866_v27 = vld [vmem:[#allocation3 + $0x618] sm:$0xff]  ;;  %v897_v28 = vld [vmem:[#allocation3 + $0x710] sm:$0xff] }
 0x249   : > { %1819 = vmatpush3.msra.mxu1 %v835_v30  ;;  %1783 = vmatprep.subr.mxu0 %v819_v31  ;;  %v881_v29 = vld [vmem:[#allocation3 + $0x690] sm:$0xff]  ;;  %v896_v31 = vld [vmem:[#allocation3 + $0x708] sm:$0xff] }
 0x24a   : > { %1820 = vmatprep.subr.mxu1 %v850_v32  ;;  %1784 = vmatpush3.msra.mxu0 %v803_v33  ;;  %v865_v30 = vld [vmem:[#allocation3 + $0x610] sm:$0xff]  ;;  %v880_v32 = vld [vmem:[#allocation3 + $0x688] sm:$0xff] }
 0x24b   : > { %1821 = vmatpush3.msra.mxu1 %v834_v34  ;;  %1785 = vmatprep.subr.mxu0 %v818_v35  ;;  %v864_v33 = vld [vmem:[#allocation3 + $0x608] sm:$0xff]  ;;  %v895_v34 = vld [vmem:[#allocation3 + $0x700] sm:$0xff] }
 0x24c   : > { %1822 = vmatprep.subr.mxu1 %v849_v40  ;;  %1786 = vmatpush3.msra.mxu0 %v802_v41  ;;  %v879_v35 = vld [vmem:[#allocation3 + $0x680] sm:$0xff]  ;;  %v669_v41 = vrot.slane %v2446_v36, 7 }
 0x24d   : > { %1823 = vmatpush3.msra.mxu1 %v833_v42  ;;  %1787 = vmatprep.subr.mxu0 %v817_v43  ;;  %v863_v40 = vld [vmem:[#allocation3 + $0x600] sm:$0xff]  ;;  %v665_v42 = vrot.slane %v2446_v36, 5 }
 0x24e   : > { %1824 = vmatprep.subr.mxu1 %v848_v44  ;;  %1788 = vmatpush3.msra.mxu0 %v801_v45 }
 0x24f   : > { %1825 = vmatpush3.msra.mxu1 %v832_v46  ;;  %1789 = vmatprep.subr.mxu0 %v816_v47 }
 0x250   : > { %1826 = vmatprep.subr.mxu1 %v847_v48  ;;  %1790 = vmatpush3.msra.mxu0 %v800_v49  ;;  %v911_v48 = vld [vmem:[%s2537_s6] sm:$0x1] }
 0x251   : > { %1827 = vmatpush3.msra.mxu1 %v831_v50  ;;  %1791 = vmatprep.subr.mxu0 %v815_v51 }
 0x252   : > { %1327 = vmatmul.mubr.f32.vlgmr.msra.gmra.mxu1 %v661_v52  ;;  %1883 = vmatprep.subr.mxu1 %v2111_v0 }
 0x253   : > { %1792 = vmatpush3.msra.mxu0 %v799_v53  ;;  %1884 = vmatpush3.msra.mxu1 %v910_v54 }
 0x254   : > { %1257 = vmatmul.mubr.f32.vlgmr.msra.gmra.mxu0 %v644_v37  ;;  %1831 = vmatprep.subr.mxu0 %v894_v55  ;;  %v891_v37 = vld [vmem:[#allocation3 + $0x6e0] sm:$0xff] }
 0x255   : > { %1885 = vmatprep.subr.mxu1 %v2111_v0  ;;  %1832 = vmatpush3.msra.mxu0 %v878_v56 }
 0x256   : > { %1396 = vmatprep.mubr.f32.mxu0 %v667_v58  ;;  %1886 = vmatpush3.msra.mxu1 %v909_v57 }
 0x257   : > { %1833 = vmatprep.subr.mxu0 %v893_v59  ;;  %1887 = vmatprep.subr.mxu1 %v2111_v0 }
 0x258   : > { %1834 = vmatpush3.msra.mxu0 %v877_v60  ;;  %1888 = vmatpush3.msra.mxu1 %v908_v61 }
 0x259   : > { %1835 = vmatprep.subr.mxu0 %v892_v62  ;;  %1889 = vmatprep.subr.mxu1 %v2111_v0 }
 0x25a   : > { %1836 = vmatpush3.msra.mxu0 %v876_v38  ;;  %1890 = vmatpush3.msra.mxu1 %v907_v39 }
 0x25b   : > { %1837 = vmatprep.subr.mxu0 %v891_v37  ;;  %1891 = vmatprep.subr.mxu1 %v2111_v0 }
 0x25c   : > { %1838 = vmatpush3.msra.mxu0 %v875_v63  ;;  %1892 = vmatpush3.msra.mxu1 %v906_v1 }
 0x25d   : > { %1839 = vmatprep.subr.mxu0 %v890_v2  ;;  %1893 = vmatprep.subr.mxu1 %v2111_v0 }
 0x25e   : > { %1840 = vmatpush3.msra.mxu0 %v874_v3  ;;  %1894 = vmatpush3.msra.mxu1 %v905_v4 }
 0x25f   : > { %1841 = vmatprep.subr.mxu0 %v889_v5  ;;  %1895 = vmatprep.subr.mxu1 %v2111_v0 }
 0x260   : > { %1842 = vmatpush3.msra.mxu0 %v873_v6  ;;  %1896 = vmatpush3.msra.mxu1 %v904_v7 }
 0x261   : > { %1843 = vmatprep.subr.mxu0 %v888_v8  ;;  %1897 = vmatprep.subr.mxu1 %v2111_v0 }
 0x262   : > { %1844 = vmatpush3.msra.mxu0 %v872_v9  ;;  %1898 = vmatpush3.msra.mxu1 %v903_v10 }
 0x263   : > { %1845 = vmatprep.subr.mxu0 %v887_v11  ;;  %1899 = vmatprep.subr.mxu1 %v2111_v0 }
 0x264   : > { %1846 = vmatpush3.msra.mxu0 %v871_v12  ;;  %1900 = vmatpush3.msra.mxu1 %v902_v13 }
 0x265   : > { %1847 = vmatprep.subr.mxu0 %v886_v14  ;;  %1901 = vmatprep.subr.mxu1 %v2111_v0 }
 0x266   : > { %1848 = vmatpush3.msra.mxu0 %v870_v15  ;;  %1902 = vmatpush3.msra.mxu1 %v901_v16 }
 0x267   : > { %1849 = vmatprep.subr.mxu0 %v885_v17  ;;  %1903 = vmatprep.subr.mxu1 %v2111_v0 }
 0x268   : > { %1850 = vmatpush3.msra.mxu0 %v869_v18  ;;  %1904 = vmatpush3.msra.mxu1 %v900_v19 }
 0x269   : > { %1851 = vmatprep.subr.mxu0 %v884_v20  ;;  %1905 = vmatprep.subr.mxu1 %v2111_v0 }
 0x26a   : > { %1852 = vmatpush3.msra.mxu0 %v868_v21  ;;  %1906 = vmatpush3.msra.mxu1 %v899_v22 }
 0x26b   : > { %1853 = vmatprep.subr.mxu0 %v883_v23  ;;  %1907 = vmatprep.subr.mxu1 %v2111_v0 }
 0x26c   : > { %1854 = vmatpush3.msra.mxu0 %v867_v24  ;;  %1908 = vmatpush3.msra.mxu1 %v898_v25 }
 0x26d   : > { %1855 = vmatprep.subr.mxu0 %v882_v26  ;;  %1909 = vmatprep.subr.mxu1 %v2111_v0 }
 0x26e   : > { %1856 = vmatpush3.msra.mxu0 %v866_v27  ;;  %1910 = vmatpush3.msra.mxu1 %v897_v28 }
 0x26f   : > { %1857 = vmatprep.subr.mxu0 %v881_v29  ;;  %1911 = vmatprep.subr.mxu1 %v2111_v0 }
 0x270   : > { %1858 = vmatpush3.msra.mxu0 %v865_v30  ;;  %1912 = vmatpush3.msra.mxu1 %v896_v31 }
 0x271   : > { %1859 = vmatprep.subr.mxu0 %v880_v32  ;;  %1913 = vmatprep.subr.mxu1 %v2111_v0 }
 0x272   : > { %1860 = vmatpush3.msra.mxu0 %v864_v33  ;;  %1914 = vmatpush3.msra.mxu1 %v895_v34 }
 0x273   : > { %1915 = vmatprep.mubr.msk.f32.mxu1 %vm2112_vm10, %v2111_v0  ;;  %1861 = vmatprep.subr.mxu0 %v879_v35 }
 0x274   : > { %1916 = vmatmul.mubr.f32.vlgmr.msra.gmra.mxu1 %v669_v41  ;;  %1862 = vmatpush3.msra.mxu0 %v863_v40 }
 0x275   : > { %1397 = vmatmul.mubr.f32.vlgmr.msra.gmra.mxu0 %v665_v42 }
 0x2cf   : > { %v1688_v45 = vpop.f32.mrf.mxu1 }
 0x2d1   : > { %v1653_v43 = vpop.f32.mrf.mxu0  ;;  %v1689_v49 = vpop.f32.mrf.mxu1 }
 0x2d2   : > { %v1690_v53 = vadd.f32 %v1689_v49, %v1688_v45 }
 0x2d3   : > { %v1654_v44 = vpop.f32.mrf.mxu0 }
 0x2d4   : > { %v1655_v47 = vadd.f32 %v1654_v44, %v1653_v43 }
 0x2d6   : > { %v979_v51 = vadd.f32 %v1655_v47, %v911_v48 }
 0x2d8   : > { %v1049_v55 = vadd.f32 %v1690_v53, %v979_v51 }
 0x2f0   : > { %v1758_v0 = vpop.f32.mrf.mxu1 }
 0x2f2   : > { %v1723_v46 = vpop.f32.mrf.mxu0  ;;  %v1759_v54 = vpop.f32.mrf.mxu1 }
 0x2f3   : > { %v1760_v59 = vadd.f32 %v1759_v54, %v1758_v0 }
 0x2f4   : > { %v1724_v50 = vpop.f32.mrf.mxu0 }
 0x2f5   : > { %v1725_v36 = vadd.f32 %v1724_v50, %v1723_v46 }
 0x2f7   : > { %v1119_v57 = vadd.f32 %v1725_v36, %v1049_v55 }
 0x2f9   : > { %v1189_v62 = vadd.f32 %v1760_v59, %v1119_v57 }
 0x312   : > { %v1828_v58 = vpop.f32.mrf.mxu1 }
 0x314   : > { %v1793_v52 = vpop.f32.mrf.mxu0  ;;  %v1829_v61 = vpop.f32.mrf.mxu1 }
 0x315   : > { %v1830_v63 = vadd.f32 %v1829_v61, %v1828_v58 }
 0x316   : > { %v1794_v56 = vpop.f32.mrf.mxu0 }
 0x317   : > { %v1795_v60 = vadd.f32 %v1794_v56, %v1793_v52 }
 0x319   : > { %v1259_v38 = vadd.f32 %v1795_v60, %v1189_v62 }
 0x31b   : > { %v1329_v3 = vadd.f32 %v1830_v63, %v1259_v38 }
 0x334   : > { %v1468_v39 = vpop.f32.mrf.mxu1 }
 0x335   : > { %v1863_v37 = vpop.f32.mrf.mxu0 }
 0x336   : > { %v1917_v1 = vpop.f32.mrf.mxu1 }
 0x337   : > { %v1864_v2 = vpop.f32.mrf.mxu0 }
 0x338   : > { %v1865_v4 = vadd.f32 %v1864_v2, %v1863_v37 }
 0x33a   : > { %v1399_v5 = vadd.f32 %v1865_v4, %v1329_v3 }
 0x33c   : > { %v1469_v6 = vadd.f32 %v1468_v39, %v1399_v5 }
 0x33e   : > { %1472 = vst [vmem:[%s308_s12] sm:$0x1] %v1469_v6 }
 0x33f   : > { %2039 = shalt.err (!%p2036_p3)
}
 0x340   : > { %s2040_s16 = scalar_lea.hbm %s1484_s8, 16  ;;  %s2044_s22 = scalar_lea.hbm %s2538_s7, 32 }
 0x341   : > { %p2041_p5 = scmp.ne.s32.totalorder %s1484_s8, %s2040_s16  ;;  %p2045_p9 = scmp.lt.s32.totalorder %s1484_s8, %s2538_s7 }
 0x342   : > { %p2046_p10 = scmp.lt.s32.totalorder %s2044_s22, %s2040_s16 }
 0x343   : > { %p2042_p6 = pnand %p2041_p5, %p2194_p4 }
 0x344   : > { %p2047_p11 = por %p2046_p10, %p2045_p9 }
 0x345   : > { %p2043_p7 = pneg %p2042_p6 }
 0x347   : > { %p2048_p12 = pnand %p2047_p11, %p2043_p7 }
 0x349   : > { %2051 = shalt.err (!%p2048_p12)
}
 0x34a   : > { %1922 = dma.vmem_to_hbm [thread:$0]  (%p2194_p4), %s1487_s23, 16, %s1484_s8, %s1474_s17  }
 0x34b PF: > { %p1934_p13 = scmp.ge.s32.totalorder %s2106_s29, 2  ;;  %s1498_s10 = sand.u32 1, %s2086_s24  }
 0x34c   : > { %s1499_s15 = scalar_lea.sflag [#allocation5], %s1498_s10 }
 0x34d   : > { %p1929_p0 = pnand %p1934_p13, %p2201_p8 }
 0x34f   : > { %p1930_p1 = pneg %p1929_p0 }
 0x351   : > { %2081 = dma.done.wait (%p1930_p1), %s1499_s15, 16  }
 0x352   : > { %2083 = vsyncadd (%p1930_p1), %s1499_s15, 4294967280  ;;  %s21_s29 = sadd.s32 1, %s2106_s29   ;;  %s2543_s24 = smov %s2090_s25 }
 0x353   : > { %p18_p2 = scmp.ge.s32.totalorder %s21_s29, 4   ;;  %s2544_s25 = smov %s2094_s26 }
 0x354   : > { %s2545_s26 = smov %s2207_s14  ;;  %s2546_s27 = smov %s2102_s28 }
 0x355   : > { %s2547_s28 = smov %s2549_s9  ;;  %20 = sbr.rel (!%p18_p2) target bundleno = 5 (0x5), region = 93 }
 0x35a   :  { %1503 = vsyncpa [#allocation4], 1 }
 0x35b   :  { %1505 = vsyncpa [#allocation4 + $0x1], 1 }
 0x35c   :  { %1506 = vsyncpa [#allocation5], 1 }
 0x35d   :  { %1508 = vsyncpa [#allocation5 + $0x1], 1 }

</bundles_post_ra>
